<compile_context>
chip_gen: v5e
topology: v5e:2x2
jax: 0.10.0
libtpu: 0.0.40
codegen_flags: <defaults>
</compile_context>

<pallas_src>
import functools
import math

import jax
import jax.numpy as jnp
from jax import lax
from jax.experimental import pallas as pl
from jax.experimental.pallas import tpu as pltpu

_T_CHUNK = 8  # timesteps per scan chunk (sublane-dense chunk stores)


def _round_up(x, m):
    return (x + m - 1) // m * m


def _pick_tile(dim, cap, mult):
    """tile = min(cap, round_up(dim, mult)); padded dim = round_up(dim, tile)."""
    t = min(cap, _round_up(dim, mult))
    t = (t // mult) * mult
    return t, _round_up(dim, t)


def _pad2d(a, rows, cols):
    r, c = a.shape
    if r == rows and c == cols:
        return a
    return jnp.pad(a, ((0, rows - r), (0, cols - c)))


# ----------------------------- tiled matmuls -------------------------------- #

def _matmul_kernel(x_ref, w_ref, b_ref, o_ref, acc_ref):
    @pl.when(pl.program_id(2) == 0)
    def _init():
        acc_ref[...] = jnp.zeros_like(acc_ref)

    acc_ref[...] += jnp.dot(x_ref[...], w_ref[...],
                            preferred_element_type=jnp.float32)

    @pl.when(pl.program_id(2) == pl.num_programs(2) - 1)
    def _done():
        o_ref[...] = (acc_ref[...] + b_ref[...]).astype(o_ref.dtype)


def _matmul_gated_kernel(y_ref, z_ref, w_ref, b_ref, o_ref, acc_ref):
    # out = (y * SiLU(z)) @ w + b  -- gate fused into the projection;
    # gate math in f32, MXU operands bf16, accumulator f32.
    @pl.when(pl.program_id(2) == 0)
    def _init():
        acc_ref[...] = jnp.zeros_like(acc_ref)

    z = z_ref[...].astype(jnp.float32)
    g = y_ref[...].astype(jnp.float32) * (z * jax.nn.sigmoid(z))
    acc_ref[...] += jnp.dot(g.astype(jnp.bfloat16), w_ref[...],
                            preferred_element_type=jnp.float32)

    @pl.when(pl.program_id(2) == pl.num_programs(2) - 1)
    def _done():
        o_ref[...] = (acc_ref[...] + b_ref[...]).astype(o_ref.dtype)


def _tiled_matmul(kernel, lhs_list, w, b, out_dtype):
    M, K = lhs_list[0].shape
    N = w.shape[1]
    tm, Mp = _pick_tile(M, 512, 8)
    tk, Kp = _pick_tile(K, 512, 128)
    tn, Np = _pick_tile(N, 512, 128)

    lhs_p = [_pad2d(a, Mp, Kp).astype(jnp.bfloat16) for a in lhs_list]
    w_p = _pad2d(w, Kp, Np).astype(jnp.bfloat16)
    b_p = _pad2d(b.reshape(1, N).astype(jnp.float32), 1, Np)

    grid = (Mp // tm, Np // tn, Kp // tk)
    lhs_spec = pl.BlockSpec((tm, tk), lambda i, j, k: (i, k))
    out = pl.pallas_call(
        kernel,
        out_shape=jax.ShapeDtypeStruct((Mp, Np), out_dtype),
        grid_spec=pltpu.PrefetchScalarGridSpec(
            num_scalar_prefetch=0,
            grid=grid,
            in_specs=[lhs_spec] * len(lhs_list) + [
                pl.BlockSpec((tk, tn), lambda i, j, k: (k, j)),
                pl.BlockSpec((1, tn), lambda i, j, k: (0, j)),
            ],
            out_specs=pl.BlockSpec((tm, tn), lambda i, j, k: (i, j)),
            scratch_shapes=[pltpu.VMEM((tm, tn), jnp.float32)],
        ),
        compiler_params=pltpu.CompilerParams(
            dimension_semantics=("parallel", "parallel", "arbitrary")),
    )(*lhs_p, w_p, b_p)
    if Mp != M or Np != N:
        out = out[:M, :N]
    return out


def linear(x2d, w, b, out_dtype=jnp.bfloat16):
    return _tiled_matmul(_matmul_kernel, [x2d], w, b, out_dtype)


def gated_linear(y2d, z2d, w, b, out_dtype=jnp.bfloat16):
    return _tiled_matmul(_matmul_gated_kernel, [y2d, z2d], w, b, out_dtype)


# ------------------------- depthwise causal conv + SiLU --------------------- #

def _conv_silu_kernel(xp_ref, w_ref, b_ref, o_ref):
    # xp: (L+K-1, CT) causal-padded (batch squeezed); w: (K, CT); b: (1, CT)
    # TODO(synk): tap shifts use value slices at sublane offsets 1..K-1; a
    # pltpu.roll-based formulation would keep them on the XLU slot.
    K = w_ref.shape[0]
    L = o_ref.shape[0]
    xp = xp_ref[...].astype(jnp.float32)
    w = w_ref[...]
    acc = xp[0:L] * w[0:1]
    for k in range(1, K):                      # K static & small (4)
        acc = acc + xp[k:k + L] * w[k:k + 1]
    acc = acc + b_ref[...]
    o_ref[...] = (acc * jax.nn.sigmoid(acc)).astype(o_ref.dtype)  # SiLU fused


def conv_silu(x, w, b):
    # x: (B, L, C) bf16; w: (K, 1, C) f32; b: (1, 1, C) f32
    Bsz, L, C = x.shape
    K = w.shape[0]
    CT = 128
    Cp = _round_up(C, CT)
    xp = jnp.pad(x, ((0, 0), (K - 1, 0), (0, Cp - C)))    # causal left pad (XLA)
    w2 = _pad2d(w.reshape(K, C), K, Cp)
    b2 = _pad2d(b.reshape(1, C), 1, Cp)
    out = pl.pallas_call(
        _conv_silu_kernel,
        out_shape=jax.ShapeDtypeStruct((Bsz, L, Cp), jnp.bfloat16),
        grid_spec=pltpu.PrefetchScalarGridSpec(
            num_scalar_prefetch=0,
            grid=(Bsz, Cp // CT),
            in_specs=[
                pl.BlockSpec((None, L + K - 1, CT), lambda bi, c: (bi, 0, c)),
                pl.BlockSpec((K, CT), lambda bi, c: (0, c)),
                pl.BlockSpec((1, CT), lambda bi, c: (0, c)),
            ],
            out_specs=pl.BlockSpec((None, L, CT), lambda bi, c: (bi, 0, c)),
        ),
        compiler_params=pltpu.CompilerParams(
            dimension_semantics=("parallel", "parallel")),
    )(xp, w2, b2)
    return out if Cp == C else out[..., :C]


# ------------------------------ selective SSM scan -------------------------- #

def _ssm_scan_kernel(dt_ref, bc_ref, x_ref, At_ref, D_ref, y_ref, h_ref):
    # Per (batch b, channel-tile c, L-tile l) grid step:
    #   dt, x, y : (LT, CT)   bc = [B|C] : (LT, 2S)   At : (S, CT)   D : (1, CT)
    #   h_ref    : (S, CT) f32 scratch -- recurrent state carried across L-tiles.
    # TODO(synk): a Mamba2-style chunked (matmul) scan would move this onto
    # the MXU; kept as a VPU recurrence with a hoisted vector pre-pass.
    LT, CT = dt_ref.shape
    S = At_ref.shape[0]
    T = _T_CHUNK

    @pl.when(pl.program_id(2) == 0)
    def _init():
        h_ref[...] = jnp.zeros_like(h_ref)

    At = At_ref[...]                 # (S, CT) f32
    Dv = D_ref[...]                  # (1, CT) f32

    def chunk(ci, h):
        t0 = pl.multiple_of(ci * T, T)
        dt_c = jax.nn.softplus(dt_ref[pl.ds(t0, T)].astype(jnp.float32))  # (T, CT)
        x_c = x_ref[pl.ds(t0, T)].astype(jnp.float32)                     # (T, CT)
        bcT = jnp.transpose(bc_ref[pl.ds(t0, T)].astype(jnp.float32))     # (2S, T)
        dtx_c = dt_c * x_c
        # Hoisted pre-pass (independent of h): decay, input term and the
        # lane-broadcast C columns are all off the serial dependence chain.
        dA = [jnp.exp(dt_c[t:t + 1, :] * At) for t in range(T)]           # T x (S,CT)
        dBx = [dtx_c[t:t + 1, :] * bcT[:S, t:t + 1] for t in range(T)]    # T x (S,CT)
        Cc = [bcT[S:, t:t + 1] for t in range(T)]                         # T x (S,1)
        ys = []
        for t in range(T):           # unrolled; serial chain = 2 VALU ops on h
            h = dA[t] * h + dBx[t]
            ys.append(jnp.sum(h * Cc[t], axis=0, keepdims=True))          # (1, CT)
        y_c = jnp.concatenate(ys, axis=0) + Dv * x_c                      # (T, CT)
        y_ref[pl.ds(t0, T)] = y_c.astype(y_ref.dtype)   # one dense chunk store
        return h

    h_fin = lax.fori_loop(0, LT // T, chunk, h_ref[...])
    h_ref[...] = h_fin               # carry state into the next L-tile


def ssm_scan(dt, bc, xc, At, D):
    # dt, xc: (B, L, d_inner) bf16; bc = [B|C]: (B, L, 2*d_state) bf16
    # At = A^T (d_state, d_inner) f32 with A = -exp(A_log); D: (d_inner,) f32
    Bsz, L, d_inner = xc.shape
    S = At.shape[0]
    S2 = bc.shape[-1]
    CT = 128
    Cp = _round_up(d_inner, CT)
    LT, Lp = _pick_tile(L, 512, _T_CHUNK)

    def pad3(a, feat):
        dl, df = Lp - a.shape[1], feat - a.shape[-1]
        if dl == 0 and df == 0:
            return a
        return jnp.pad(a, ((0, 0), (0, dl), (0, df)))

    dt_p = pad3(dt, Cp)
    x_p = pad3(xc, Cp)
    bc_p = pad3(bc, S2)
    At_p = _pad2d(At, S, Cp)
    D_p = _pad2d(D.reshape(1, d_inner), 1, Cp)

    grid = (Bsz, Cp // CT, Lp // LT)
    flops = 6 * Bsz * Lp * S * Cp
    trans = Bsz * Lp * S * Cp + 3 * Bsz * Lp * Cp
    bytes_acc = 2 * (3 * Bsz * Lp * Cp + Bsz * Lp * S2) + 4 * (S * Cp + Cp)

    y = pl.pallas_call(
        _ssm_scan_kernel,
        out_shape=jax.ShapeDtypeStruct((Bsz, Lp, Cp), jnp.bfloat16),
        grid_spec=pltpu.PrefetchScalarGridSpec(
            num_scalar_prefetch=0,
            grid=grid,
            in_specs=[
                pl.BlockSpec((None, LT, CT), lambda b, c, l: (b, l, c)),   # dt
                pl.BlockSpec((None, LT, S2), lambda b, c, l: (b, l, 0)),   # [B|C]
                pl.BlockSpec((None, LT, CT), lambda b, c, l: (b, l, c)),   # x
                pl.BlockSpec((S, CT), lambda b, c, l: (0, c)),             # A^T
                pl.BlockSpec((1, CT), lambda b, c, l: (0, c)),             # D
            ],
            out_specs=pl.BlockSpec((None, LT, CT), lambda b, c, l: (b, l, c)),
            scratch_shapes=[pltpu.VMEM((S, CT), jnp.float32)],             # h state
        ),
        compiler_params=pltpu.CompilerParams(
            dimension_semantics=("parallel", "parallel", "arbitrary")),
        cost_estimate=pl.CostEstimate(flops=flops, transcendentals=trans,
                                      bytes_accessed=bytes_acc),
    )(dt_p, bc_p, x_p, At_p, D_p)
    return y[:, :L, :d_inner]


# ------------------------- LayerNorm (+ fused head matmul) ------------------ #

def _layernorm_kernel(x_ref, g_ref, b_ref, o_ref):
    x = x_ref[...].astype(jnp.float32)
    mu = jnp.mean(x, axis=-1, keepdims=True)
    var = jnp.mean(jnp.square(x - mu), axis=-1, keepdims=True)
    o_ref[...] = ((x - mu) * lax.rsqrt(var + 1e-5) * g_ref[...]
                  + b_ref[...]).astype(o_ref.dtype)


def layer_norm(x2d, gamma, beta):
    # Fallback (row-tiled) standalone LayerNorm.
    M, D = x2d.shape
    tm, Mp = _pick_tile(M, 1024, 8)
    x_p = _pad2d(x2d, Mp, D)
    out = pl.pallas_call(
        _layernorm_kernel,
        out_shape=jax.ShapeDtypeStruct((Mp, D), jnp.bfloat16),
        grid_spec=pltpu.PrefetchScalarGridSpec(
            num_scalar_prefetch=0,
            grid=(Mp // tm,),
            in_specs=[pl.BlockSpec((tm, D), lambda i: (i, 0)),
                      pl.BlockSpec((1, D), lambda i: (0, 0)),
                      pl.BlockSpec((1, D), lambda i: (0, 0))],
            out_specs=pl.BlockSpec((tm, D), lambda i: (i, 0)),
        ),
        compiler_params=pltpu.CompilerParams(dimension_semantics=("parallel",)),
    )(x_p, gamma.reshape(1, D), beta.reshape(1, D))
    return out if Mp == M else out[:M]


def _ln_matmul_kernel(d_true, x_ref, g_ref, bt_ref, w_ref, ob_ref, o_ref):
    # o = LayerNorm(x) @ w + b ; statistics over the true (unpadded) feature dim
    # (padded x columns are zero, gamma/beta padding is zero => padded cols -> 0).
    x = x_ref[...].astype(jnp.float32)                    # (tm, Kp)
    inv_d = 1.0 / d_true
    mu = jnp.sum(x, axis=-1, keepdims=True) * inv_d
    var = jnp.sum(x * x, axis=-1, keepdims=True) * inv_d - mu * mu
    xn = (x - mu) * lax.rsqrt(var + 1e-5) * g_ref[...] + bt_ref[...]
    acc = jnp.dot(xn.astype(jnp.bfloat16), w_ref[...],
                  preferred_element_type=jnp.float32)
    o_ref[...] = (acc + ob_ref[...]).astype(o_ref.dtype)


def layernorm_linear(x2d, gamma, beta, w, b):
    M, D = x2d.shape
    N = w.shape[1]
    Kp = _round_up(D, 128)
    if Kp > 1024:   # K does not fit one lhs tile -> separate LN + matmul
        return linear(layer_norm(x2d, gamma, beta), w, b, out_dtype=jnp.float32)
    tm, Mp = _pick_tile(M, 512, 8)
    tn, Np = _pick_tile(N, 512, 128)
    x_p = _pad2d(x2d, Mp, Kp)
    g_p = _pad2d(gamma.reshape(1, D), 1, Kp)
    bt_p = _pad2d(beta.reshape(1, D), 1, Kp)
    w_p = _pad2d(w, Kp, Np).astype(jnp.bfloat16)
    ob_p = _pad2d(b.reshape(1, N), 1, Np)
    out = pl.pallas_call(
        functools.partial(_ln_matmul_kernel, float(D)),
        out_shape=jax.ShapeDtypeStruct((Mp, Np), jnp.float32),
        grid_spec=pltpu.PrefetchScalarGridSpec(
            num_scalar_prefetch=0,
            grid=(Mp // tm, Np // tn),
            in_specs=[
                pl.BlockSpec((tm, Kp), lambda i, j: (i, 0)),
                pl.BlockSpec((1, Kp), lambda i, j: (0, 0)),
                pl.BlockSpec((1, Kp), lambda i, j: (0, 0)),
                pl.BlockSpec((Kp, tn), lambda i, j: (0, j)),
                pl.BlockSpec((1, tn), lambda i, j: (0, j)),
            ],
            out_specs=pl.BlockSpec((tm, tn), lambda i, j: (i, j)),
        ),
        compiler_params=pltpu.CompilerParams(
            dimension_semantics=("parallel", "parallel")),
    )(x_p, g_p, bt_p, w_p, ob_p)
    if Mp != M or Np != N:
        out = out[:M, :N]
    return out


# ------------------------------ params / glue -------------------------------- #

def make_positional_encoding(max_len, d_model):
    position = jnp.arange(max_len, dtype=jnp.float32)[:, None]
    div_term = jnp.exp(jnp.arange(0, d_model, 2, dtype=jnp.float32)
                       * (-math.log(10000.0) / d_model))
    pe = jnp.zeros((max_len, d_model), jnp.float32)
    pe = pe.at[:, 0::2].set(jnp.sin(position * div_term))
    pe = pe.at[:, 1::2].set(jnp.cos(position * div_term))
    return pe


def init_mamba_layer(key, d_model, d_inner, d_state, d_conv, dt_rank):
    ks = jax.random.split(key, 6)
    std = 0.02
    in_w = std * jax.random.normal(ks[0], (d_model, 2 * d_inner), jnp.float32)
    conv_w = std * jax.random.normal(ks[1], (d_conv, 1, d_inner), jnp.float32)
    conv_b = jnp.zeros((1, 1, d_inner), jnp.float32)
    xproj_w = std * jax.random.normal(ks[2], (d_inner, dt_rank + 2 * d_state),
                                      jnp.float32)
    dt_w = std * jax.random.normal(ks[3], (dt_rank, d_inner), jnp.float32)
    dt_b = 0.1 + std * jax.random.normal(ks[4], (d_inner,), jnp.float32)
    # Fold the low-rank dt projection into x_proj (exact: x_proj has bias=False).
    fused_w = jnp.concatenate([xproj_w[:, :dt_rank] @ dt_w,
                               xproj_w[:, dt_rank:]], axis=1)
    fused_b = jnp.concatenate([dt_b, jnp.zeros((2 * d_state,), jnp.float32)])
    A_log = jnp.log(jnp.broadcast_to(
        jnp.arange(1, d_state + 1, dtype=jnp.float32), (d_inner, d_state)))
    return {
        "in_w": in_w,
        "in_b": jnp.zeros((2 * d_inner,), jnp.float32),   # Mamba in_proj: bias=False
        "conv_w": conv_w,
        "conv_b": conv_b,
        "xproj_fused_w": fused_w,
        "xproj_fused_b": fused_b,
        "At": -jnp.exp(A_log).T,                          # (d_state, d_inner)
        "D": jnp.ones((d_inner,), jnp.float32),
        "out_w": std * jax.random.normal(ks[5], (d_inner, d_model), jnp.float32),
        "out_b": jnp.zeros((d_model,), jnp.float32),
    }


def init_params(key, *, input_vocab, target_vocab, d_model, n_layers,
                d_state, d_conv, expand, max_len):
    d_inner = expand * d_model
    dt_rank = math.ceil(d_model / 16)
    keys = jax.random.split(key, n_layers + 3)
    return {
        "emb": 0.02 * jax.random.normal(keys[0], (input_vocab, d_model), jnp.float32),
        "pe": make_positional_encoding(max_len, d_model),
        "ln_g": jnp.ones((d_model,), jnp.float32),
        "ln_b": jnp.zeros((d_model,), jnp.float32),
        "out_w": 0.02 * jax.random.normal(keys[1], (d_model, target_vocab), jnp.float32),
        "out_b": jnp.zeros((target_vocab,), jnp.float32),
        "layers": [init_mamba_layer(keys[2 + i], d_model, d_inner, d_state,
                                    d_conv, dt_rank) for i in range(n_layers)],
    }


def mamba_layer(x, p):
    B, L, d_model = x.shape
    d_inner = p["conv_w"].shape[-1]
    M = B * L
    xz = linear(x.reshape(M, d_model), p["in_w"], p["in_b"])       # bf16
    xz = xz.reshape(B, L, 2 * d_inner)
    xc, z = xz[..., :d_inner], xz[..., d_inner:]
    xc = conv_silu(xc, p["conv_w"], p["conv_b"])                   # (B, L, d_inner) bf16
    dbc = linear(xc.reshape(M, d_inner), p["xproj_fused_w"], p["xproj_fused_b"])
    dbc = dbc.reshape(B, L, -1)
    dt = dbc[..., :d_inner]
    bc = dbc[..., d_inner:]                                        # packed lane-dense [B|C]
    y = ssm_scan(dt, bc, xc, p["At"], p["D"])                      # (B, L, d_inner) bf16
    out = gated_linear(y.reshape(M, d_inner), z.reshape(M, d_inner),
                       p["out_w"], p["out_b"])                     # gate fused here
    return out.reshape(B, L, d_model)


@jax.jit
def forward(params, src_byte_indices):
    emb = params["emb"]
    d_model = emb.shape[1]                      # static python int under jit
    target_vocab = params["out_w"].shape[1]
    B, L = src_byte_indices.shape
    # TODO(synk): embedding row-gather + pos-enc scale/add stay as XLA glue
    # (data-dependent gather; dropout is identity in eval mode).
    x = jnp.take(emb, src_byte_indices, axis=0) * math.sqrt(d_model)
    x = (x + params["pe"][None, :L, :]).astype(jnp.bfloat16)
    for lp in params["layers"]:
        x = mamba_layer(x, lp)
    logits = layernorm_linear(x.reshape(B * L, d_model),
                              params["ln_g"], params["ln_b"],
                              params["out_w"], params["out_b"])    # LN fused into head
    return logits.reshape(B, L, target_vocab)


# ----------------------------------- main ------------------------------------ #

if __name__ == "__main__":
    INPUT_VOCAB = 64
    TARGET_VOCAB = 16
    D_MODEL = 32
    N_LAYERS = 2
    D_STATE = 8
    D_CONV = 4
    EXPAND = 2
    BATCH, SEQ = 2, 8
    MAX_LEN = 16

    key = jax.random.PRNGKey(0)
    pkey, ikey = jax.random.split(key)
    params = init_params(pkey, input_vocab=INPUT_VOCAB, target_vocab=TARGET_VOCAB,
                         d_model=D_MODEL, n_layers=N_LAYERS, d_state=D_STATE,
                         d_conv=D_CONV, expand=EXPAND, max_len=MAX_LEN)
    src = jax.random.randint(ikey, (BATCH, SEQ), 0, INPUT_VOCAB, dtype=jnp.int32)

    logits = forward(params, src)
    jax.block_until_ready(logits)
    assert logits.shape == (BATCH, SEQ, TARGET_VOCAB)
    assert bool(jnp.all(jnp.isfinite(logits)))
    print("KERNEL_OK")
</pallas_src>

<mosaic_0001>
module attributes {stable_mosaic.version = 11 : i64} {
  func.func @_matmul_kernel(%arg0: i32, %arg1: i32, %arg2: i32, %arg3: memref<16x128xbf16, #tpu.memory_space<vmem>>, %arg4: memref<128x128xbf16, #tpu.memory_space<vmem>>, %arg5: memref<1x128xf32, #tpu.memory_space<vmem>>, %arg6: memref<16x128xbf16, #tpu.memory_space<vmem>>, %arg7: memref<16x128xf32, #tpu.memory_space<vmem>>) attributes {dimension_semantics = [#tpu.dimension_semantics<parallel>, #tpu.dimension_semantics<parallel>, #tpu.dimension_semantics<arbitrary>], iteration_bounds = array<i64: 1, 1, 1>, scalar_prefetch = 0 : i64, scratch_operands = 1 : i64, tpu.core_type = #tpu.core_type<tc>, window_params = [{transform_indices = @transform_0, window_bounds = array<i64: 16, 128>}, {transform_indices = @transform_1, window_bounds = array<i64: 128, 128>}, {transform_indices = @transform_2, window_bounds = array<i64: 1, 128>}, {transform_indices = @transform_3, window_bounds = array<i64: 16, 128>}]} {
    %c0_i32 = arith.constant 0 : i32
    %0 = arith.cmpi eq, %arg2, %c0_i32 : i32
    %1 = arith.extui %0 : i1 to i32
    %c0_i32_0 = arith.constant 0 : i32
    %2 = arith.cmpi ne, %1, %c0_i32_0 : i32
    scf.if %2 {
      %cst_10 = arith.constant 0.000000e+00 : f32
      %12 = vector.broadcast %cst_10 : f32 to vector<16x128xf32>
      %c0_11 = arith.constant 0 : index
      %c0_12 = arith.constant 0 : index
      %13 = vector.load %arg7[%c0_11, %c0_12] : memref<16x128xf32, #tpu.memory_space<vmem>>, vector<16x128xf32>
      tpu.vector_store %arg7[%c0_11, %c0_12], %12 {strides = array<i32>} : memref<16x128xf32, #tpu.memory_space<vmem>>, vector<16x128xf32>,
    } else {
    }
    %c0 = arith.constant 0 : index
    %c0_1 = arith.constant 0 : index
    %3 = vector.load %arg7[%c0, %c0_1] : memref<16x128xf32, #tpu.memory_space<vmem>>, vector<16x128xf32>
    %c0_2 = arith.constant 0 : index
    %c0_3 = arith.constant 0 : index
    %4 = vector.load %arg3[%c0_2, %c0_3] : memref<16x128xbf16, #tpu.memory_space<vmem>>, vector<16x128xbf16>
    %c0_4 = arith.constant 0 : index
    %c0_5 = arith.constant 0 : index
    %5 = vector.load %arg4[%c0_4, %c0_5] : memref<128x128xbf16, #tpu.memory_space<vmem>>, vector<128x128xbf16>
    %cst = arith.constant dense<0.000000e+00> : vector<16x128xf32>
    %6 = tpu.matmul %4, %5, %cst {dimension_numbers = #tpu.dot_dimension_numbers<[1], [0], [0], [1], [0, 0, 1, 1], [], []>} : vector<16x128xbf16>, vector<128x128xbf16>, vector<16x128xf32> -> vector<16x128xf32>
    %7 = arith.addf %3, %6 : vector<16x128xf32>
    %c0_6 = arith.constant 0 : index
    %c0_7 = arith.constant 0 : index
    %8 = vector.load %arg7[%c0_6, %c0_7] : memref<16x128xf32, #tpu.memory_space<vmem>>, vector<16x128xf32>
    tpu.vector_store %arg7[%c0_6, %c0_7], %7 {strides = array<i32>} : memref<16x128xf32, #tpu.memory_space<vmem>>, vector<16x128xf32>,
    %c0_i32_8 = arith.constant 0 : i32
    %9 = arith.cmpi eq, %arg2, %c0_i32_8 : i32
    %10 = arith.extui %9 : i1 to i32
    %c0_i32_9 = arith.constant 0 : i32
    %11 = arith.cmpi ne, %10, %c0_i32_9 : i32
    scf.if %11 {
      %c0_10 = arith.constant 0 : index
      %c0_11 = arith.constant 0 : index
      %12 = vector.load %arg7[%c0_10, %c0_11] : memref<16x128xf32, #tpu.memory_space<vmem>>, vector<16x128xf32>
      %c0_12 = arith.constant 0 : index
      %c0_13 = arith.constant 0 : index
      %13 = vector.load %arg5[%c0_12, %c0_13] : memref<1x128xf32, #tpu.memory_space<vmem>>, vector<1x128xf32>
      %14 = vector.broadcast %13 : vector<1x128xf32> to vector<16x128xf32>
      %15 = arith.addf %12, %14 : vector<16x128xf32>
      %16 = arith.truncf %15 : vector<16x128xf32> to vector<16x128xbf16>
      %c0_14 = arith.constant 0 : index
      %c0_15 = arith.constant 0 : index
      %17 = vector.load %arg6[%c0_14, %c0_15] : memref<16x128xbf16, #tpu.memory_space<vmem>>, vector<16x128xbf16>
      tpu.vector_store %arg6[%c0_14, %c0_15], %16 {strides = array<i32>} : memref<16x128xbf16, #tpu.memory_space<vmem>>, vector<16x128xbf16>,
    } else {
    }
    return
  }
  func.func @transform_0(%arg0: i32, %arg1: i32, %arg2: i32) -> (i32, i32) {
    %c0_i32 = arith.constant 0 : i32
    return %arg0, %arg2 : i32, i32
  }
  func.func @transform_1(%arg0: i32, %arg1: i32, %arg2: i32) -> (i32, i32) {
    %c0_i32 = arith.constant 0 : i32
    return %arg2, %arg1 : i32, i32
  }
  func.func @transform_2(%arg0: i32, %arg1: i32, %arg2: i32) -> (i32, i32) {
    %c0_i32 = arith.constant 0 : i32
    %c0_i32_0 = arith.constant 0 : i32
    return %c0_i32, %arg1 : i32, i32
  }
  func.func @transform_3(%arg0: i32, %arg1: i32, %arg2: i32) -> (i32, i32) {
    %c0_i32 = arith.constant 0 : i32
    return %arg0, %arg1 : i32, i32
  }
}

module attributes {stable_mosaic.version = 11 : i64} {
  func.func @_conv_silu_kernel(%arg0: i32, %arg1: i32, %arg2: memref<1x11x128xbf16, #tpu.memory_space<vmem>>, %arg3: memref<4x128xf32, #tpu.memory_space<vmem>>, %arg4: memref<1x128xf32, #tpu.memory_space<vmem>>, %arg5: memref<1x8x128xbf16, #tpu.memory_space<vmem>>) attributes {dimension_semantics = [#tpu.dimension_semantics<parallel>, #tpu.dimension_semantics<parallel>], iteration_bounds = array<i64: 2, 1>, scalar_prefetch = 0 : i64, scratch_operands = 0 : i64, tpu.core_type = #tpu.core_type<tc>, window_params = [{transform_indices = @transform_0, window_bounds = array<i64: 1, 11, 128>}, {transform_indices = @transform_1, window_bounds = array<i64: 4, 128>}, {transform_indices = @transform_2, window_bounds = array<i64: 1, 128>}, {transform_indices = @transform_3, window_bounds = array<i64: 1, 8, 128>}]} {
    %c0 = arith.constant 0 : index
    %c0_0 = arith.constant 0 : index
    %c0_1 = arith.constant 0 : index
    %0 = vector.load %arg2[%c0, %c0_0, %c0_1] : memref<1x11x128xbf16, #tpu.memory_space<vmem>>, vector<1x11x128xbf16>
    %1 = vector.shape_cast %0 : vector<1x11x128xbf16> to vector<11x128xbf16>
    %2 = arith.extf %1 : vector<11x128xbf16> to vector<11x128xf32>
    %c0_2 = arith.constant 0 : index
    %c0_3 = arith.constant 0 : index
    %3 = vector.load %arg3[%c0_2, %c0_3] : memref<4x128xf32, #tpu.memory_space<vmem>>, vector<4x128xf32>
    %4 = vector.extract_strided_slice %2 {offsets = [0, 0], sizes = [8, 128], strides = [1, 1]} : vector<11x128xf32> to vector<8x128xf32>
    %5 = vector.extract_strided_slice %3 {offsets = [0, 0], sizes = [1, 128], strides = [1, 1]} : vector<4x128xf32> to vector<1x128xf32>
    %6 = vector.broadcast %5 : vector<1x128xf32> to vector<8x128xf32>
    %7 = arith.mulf %4, %6 : vector<8x128xf32>
    %8 = vector.extract_strided_slice %2 {offsets = [1, 0], sizes = [8, 128], strides = [1, 1]} : vector<11x128xf32> to vector<8x128xf32>
    %9 = vector.extract_strided_slice %3 {offsets = [1, 0], sizes = [1, 128], strides = [1, 1]} : vector<4x128xf32> to vector<1x128xf32>
    %10 = vector.broadcast %9 : vector<1x128xf32> to vector<8x128xf32>
    %11 = arith.mulf %8, %10 : vector<8x128xf32>
    %12 = arith.addf %7, %11 : vector<8x128xf32>
    %13 = vector.extract_strided_slice %2 {offsets = [2, 0], sizes = [8, 128], strides = [1, 1]} : vector<11x128xf32> to vector<8x128xf32>
    %14 = vector.extract_strided_slice %3 {offsets = [2, 0], sizes = [1, 128], strides = [1, 1]} : vector<4x128xf32> to vector<1x128xf32>
    %15 = vector.broadcast %14 : vector<1x128xf32> to vector<8x128xf32>
    %16 = arith.mulf %13, %15 : vector<8x128xf32>
    %17 = arith.addf %12, %16 : vector<8x128xf32>
    %18 = vector.extract_strided_slice %2 {offsets = [3, 0], sizes = [8, 128], strides = [1, 1]} : vector<11x128xf32> to vector<8x128xf32>
    %19 = vector.extract_strided_slice %3 {offsets = [3, 0], sizes = [1, 128], strides = [1, 1]} : vector<4x128xf32> to vector<1x128xf32>
    %20 = vector.broadcast %19 : vector<1x128xf32> to vector<8x128xf32>
    %21 = arith.mulf %18, %20 : vector<8x128xf32>
    %22 = arith.addf %17, %21 : vector<8x128xf32>
    %c0_4 = arith.constant 0 : index
    %c0_5 = arith.constant 0 : index
    %23 = vector.load %arg4[%c0_4, %c0_5] : memref<1x128xf32, #tpu.memory_space<vmem>>, vector<1x128xf32>
    %24 = vector.broadcast %23 : vector<1x128xf32> to vector<8x128xf32>
    %25 = arith.addf %22, %24 : vector<8x128xf32>
    %26 = arith.negf %25 : vector<8x128xf32>
    %27 = math.exp %26 : vector<8x128xf32>
    %cst = arith.constant 1.000000e+00 : f32
    %28 = vector.broadcast %cst : f32 to vector<8x128xf32>
    %29 = arith.addf %28, %27 : vector<8x128xf32>
    %30 = arith.divf %28, %29 : vector<8x128xf32>
    %31 = arith.mulf %25, %30 : vector<8x128xf32>
    %32 = arith.truncf %31 : vector<8x128xf32> to vector<8x128xbf16>
    %c0_6 = arith.constant 0 : index
    %c0_7 = arith.constant 0 : index
    %c0_8 = arith.constant 0 : index
    %33 = vector.load %arg5[%c0_6, %c0_7, %c0_8] : memref<1x8x128xbf16, #tpu.memory_space<vmem>>, vector<1x8x128xbf16>
    %34 = vector.shape_cast %33 : vector<1x8x128xbf16> to vector<8x128xbf16>
    %35 = vector.shape_cast %32 : vector<8x128xbf16> to vector<1x8x128xbf16>
    tpu.vector_store %arg5[%c0_6, %c0_7, %c0_8], %35 {strides = array<i32>} : memref<1x8x128xbf16, #tpu.memory_space<vmem>>, vector<1x8x128xbf16>,
    return
  }
  func.func @transform_0(%arg0: i32, %arg1: i32) -> (i32, i32, i32) {
    %c0_i32 = arith.constant 0 : i32
    %c0_i32_0 = arith.constant 0 : i32
    return %arg0, %c0_i32, %arg1 : i32, i32, i32
  }
  func.func @transform_1(%arg0: i32, %arg1: i32) -> (i32, i32) {
    %c0_i32 = arith.constant 0 : i32
    %c0_i32_0 = arith.constant 0 : i32
    return %c0_i32, %arg1 : i32, i32
  }
  func.func @transform_2(%arg0: i32, %arg1: i32) -> (i32, i32) {
    %c0_i32 = arith.constant 0 : i32
    %c0_i32_0 = arith.constant 0 : i32
    return %c0_i32, %arg1 : i32, i32
  }
  func.func @transform_3(%arg0: i32, %arg1: i32) -> (i32, i32, i32) {
    %c0_i32 = arith.constant 0 : i32
    %c0_i32_0 = arith.constant 0 : i32
    return %arg0, %c0_i32, %arg1 : i32, i32, i32
  }
}

module attributes {stable_mosaic.version = 11 : i64} {
  func.func @_ssm_scan_kernel(%arg0: i32, %arg1: i32, %arg2: i32, %arg3: memref<1x8x128xbf16, #tpu.memory_space<vmem>>, %arg4: memref<1x8x16xbf16, #tpu.memory_space<vmem>>, %arg5: memref<1x8x128xbf16, #tpu.memory_space<vmem>>, %arg6: memref<8x128xf32, #tpu.memory_space<vmem>>, %arg7: memref<1x128xf32, #tpu.memory_space<vmem>>, %arg8: memref<1x8x128xbf16, #tpu.memory_space<vmem>>, %arg9: memref<8x128xf32, #tpu.memory_space<vmem>>) attributes {dimension_semantics = [#tpu.dimension_semantics<parallel>, #tpu.dimension_semantics<parallel>, #tpu.dimension_semantics<arbitrary>], iteration_bounds = array<i64: 2, 1, 1>, scalar_prefetch = 0 : i64, scratch_operands = 1 : i64, tpu.core_type = #tpu.core_type<tc>, window_params = [{transform_indices = @transform_0, window_bounds = array<i64: 1, 8, 128>}, {transform_indices = @transform_1, window_bounds = array<i64: 1, 8, 16>}, {transform_indices = @transform_2, window_bounds = array<i64: 1, 8, 128>}, {transform_indices = @transform_3, window_bounds = array<i64: 8, 128>}, {transform_indices = @transform_4, window_bounds = array<i64: 1, 128>}, {transform_indices = @transform_5, window_bounds = array<i64: 1, 8, 128>}]} {
    %c0_i32 = arith.constant 0 : i32
    %0 = arith.cmpi eq, %arg2, %c0_i32 : i32
    %1 = arith.extui %0 : i1 to i32
    %c0_i32_0 = arith.constant 0 : i32
    %2 = arith.cmpi ne, %1, %c0_i32_0 : i32
    scf.if %2 {
      %cst_26 = arith.constant 0.000000e+00 : f32
      %174 = vector.broadcast %cst_26 : f32 to vector<8x128xf32>
      %c0_27 = arith.constant 0 : index
      %c0_28 = arith.constant 0 : index
      %175 = vector.load %arg9[%c0_27, %c0_28] : memref<8x128xf32, #tpu.memory_space<vmem>>, vector<8x128xf32>
      tpu.vector_store %arg9[%c0_27, %c0_28], %174 {strides = array<i32>} : memref<8x128xf32, #tpu.memory_space<vmem>>, vector<8x128xf32>,
    } else {
    }
    %c0 = arith.constant 0 : index
    %c0_1 = arith.constant 0 : index
    %3 = vector.load %arg6[%c0, %c0_1] : memref<8x128xf32, #tpu.memory_space<vmem>>, vector<8x128xf32>
    %c0_2 = arith.constant 0 : index
    %c0_3 = arith.constant 0 : index
    %4 = vector.load %arg7[%c0_2, %c0_3] : memref<1x128xf32, #tpu.memory_space<vmem>>, vector<1x128xf32>
    %c0_4 = arith.constant 0 : index
    %c0_5 = arith.constant 0 : index
    %5 = vector.load %arg9[%c0_4, %c0_5] : memref<8x128xf32, #tpu.memory_space<vmem>>, vector<8x128xf32>
    %c0_i32_6 = arith.constant 0 : i32
    %c8_i32 = arith.constant 8 : i32
    %6 = arith.muli %c0_i32_6, %c8_i32 : i32
    %7 = tpu.assume_multiple %6, 8 : i32
    %c0_7 = arith.constant 0 : index
    %8 = arith.index_cast %7 : i32 to index
    %c0_8 = arith.constant 0 : index
    %9 = vector.load %arg3[%c0_7, %8, %c0_8] : memref<1x8x128xbf16, #tpu.memory_space<vmem>>, vector<1x8x128xbf16>
    %10 = vector.shape_cast %9 : vector<1x8x128xbf16> to vector<8x128xbf16>
    %11 = arith.extf %10 : vector<8x128xbf16> to vector<8x128xf32>
    %cst = arith.constant 0.000000e+00 : f32
    %12 = vector.broadcast %cst : f32 to vector<8x128xf32>
    %13 = arith.maximumf %11, %12 : vector<8x128xf32>
    %14 = vector.broadcast %cst : f32 to vector<8x128xf32>
    %15 = arith.subf %11, %14 : vector<8x128xf32>
    %16 = arith.cmpf one, %15, %15 : vector<8x128xf32>
    %17 = vector.broadcast %cst : f32 to vector<8x128xf32>
    %18 = arith.addf %11, %17 : vector<8x128xf32>
    %19 = math.absf %15 : vector<8x128xf32>
    %cst_9 = arith.constant 0.000000e+00 : f32
    %20 = vector.broadcast %cst_9 : f32 to vector<8x128xf32>
    %21 = arith.subf %20, %19 : vector<8x128xf32>
    %22 = math.exp %21 : vector<8x128xf32>
    %23 = math.log1p %22 : vector<8x128xf32>
    %24 = arith.addf %13, %23 : vector<8x128xf32>
    %25 = arith.select %16, %18, %24 : vector<8x128xi1>, vector<8x128xf32>
    %c0_10 = arith.constant 0 : index
    %26 = arith.index_cast %7 : i32 to index
    %c0_11 = arith.constant 0 : index
    %27 = vector.load %arg5[%c0_10, %26, %c0_11] : memref<1x8x128xbf16, #tpu.memory_space<vmem>>, vector<1x8x128xbf16>
    %28 = vector.shape_cast %27 : vector<1x8x128xbf16> to vector<8x128xbf16>
    %29 = arith.extf %28 : vector<8x128xbf16> to vector<8x128xf32>
    %c0_12 = arith.constant 0 : index
    %30 = arith.index_cast %7 : i32 to index
    %c0_13 = arith.constant 0 : index
    %31 = vector.load %arg4[%c0_12, %30, %c0_13] : memref<1x8x16xbf16, #tpu.memory_space<vmem>>, vector<1x8x16xbf16>
    %32 = vector.shape_cast %31 : vector<1x8x16xbf16> to vector<8x16xbf16>
    %33 = arith.extf %32 : vector<8x16xbf16> to vector<8x16xf32>
    %34 = tpu.transpose %33, [1, 0] : vector<8x16xf32> -> vector<16x8xf32>
    %35 = arith.mulf %25, %29 : vector<8x128xf32>
    %36 = vector.extract_strided_slice %25 {offsets = [0, 0], sizes = [1, 128], strides = [1, 1]} : vector<8x128xf32> to vector<1x128xf32>
    %37 = vector.broadcast %36 : vector<1x128xf32> to vector<8x128xf32>
    %38 = arith.mulf %37, %3 : vector<8x128xf32>
    %39 = math.exp %38 : vector<8x128xf32>
    %40 = vector.extract_strided_slice %25 {offsets = [1, 0], sizes = [1, 128], strides = [1, 1]} : vector<8x128xf32> to vector<1x128xf32>
    %41 = vector.broadcast %40 : vector<1x128xf32> to vector<8x128xf32>
    %42 = arith.mulf %41, %3 : vector<8x128xf32>
    %43 = math.exp %42 : vector<8x128xf32>
    %44 = vector.extract_strided_slice %25 {offsets = [2, 0], sizes = [1, 128], strides = [1, 1]} : vector<8x128xf32> to vector<1x128xf32>
    %45 = vector.broadcast %44 : vector<1x128xf32> to vector<8x128xf32>
    %46 = arith.mulf %45, %3 : vector<8x128xf32>
    %47 = math.exp %46 : vector<8x128xf32>
    %48 = vector.extract_strided_slice %25 {offsets = [3, 0], sizes = [1, 128], strides = [1, 1]} : vector<8x128xf32> to vector<1x128xf32>
    %49 = vector.broadcast %48 : vector<1x128xf32> to vector<8x128xf32>
    %50 = arith.mulf %49, %3 : vector<8x128xf32>
    %51 = math.exp %50 : vector<8x128xf32>
    %52 = vector.extract_strided_slice %25 {offsets = [4, 0], sizes = [1, 128], strides = [1, 1]} : vector<8x128xf32> to vector<1x128xf32>
    %53 = vector.broadcast %52 : vector<1x128xf32> to vector<8x128xf32>
    %54 = arith.mulf %53, %3 : vector<8x128xf32>
    %55 = math.exp %54 : vector<8x128xf32>
    %56 = vector.extract_strided_slice %25 {offsets = [5, 0], sizes = [1, 128], strides = [1, 1]} : vector<8x128xf32> to vector<1x128xf32>
    %57 = vector.broadcast %56 : vector<1x128xf32> to vector<8x128xf32>
    %58 = arith.mulf %57, %3 : vector<8x128xf32>
    %59 = math.exp %58 : vector<8x128xf32>
    %60 = vector.extract_strided_slice %25 {offsets = [6, 0], sizes = [1, 128], strides = [1, 1]} : vector<8x128xf32> to vector<1x128xf32>
    %61 = vector.broadcast %60 : vector<1x128xf32> to vector<8x128xf32>
    %62 = arith.mulf %61, %3 : vector<8x128xf32>
    %63 = math.exp %62 : vector<8x128xf32>
    %64 = vector.extract_strided_slice %25 {offsets = [7, 0], sizes = [1, 128], strides = [1, 1]} : vector<8x128xf32> to vector<1x128xf32>
    %65 = vector.broadcast %64 : vector<1x128xf32> to vector<8x128xf32>
    %66 = arith.mulf %65, %3 : vector<8x128xf32>
    %67 = math.exp %66 : vector<8x128xf32>
    %68 = vector.extract_strided_slice %35 {offsets = [0, 0], sizes = [1, 128], strides = [1, 1]} : vector<8x128xf32> to vector<1x128xf32>
    %69 = vector.extract_strided_slice %34 {offsets = [0, 0], sizes = [8, 1], strides = [1, 1]} : vector<16x8xf32> to vector<8x1xf32>
    %70 = vector.broadcast %68 : vector<1x128xf32> to vector<8x128xf32>
    %71 = vector.broadcast %69 : vector<8x1xf32> to vector<8x128xf32>
    %72 = arith.mulf %70, %71 : vector<8x128xf32>
    %73 = vector.extract_strided_slice %35 {offsets = [1, 0], sizes = [1, 128], strides = [1, 1]} : vector<8x128xf32> to vector<1x128xf32>
    %74 = vector.extract_strided_slice %34 {offsets = [0, 1], sizes = [8, 1], strides = [1, 1]} : vector<16x8xf32> to vector<8x1xf32>
    %75 = vector.broadcast %73 : vector<1x128xf32> to vector<8x128xf32>
    %76 = vector.broadcast %74 : vector<8x1xf32> to vector<8x128xf32>
    %77 = arith.mulf %75, %76 : vector<8x128xf32>
    %78 = vector.extract_strided_slice %35 {offsets = [2, 0], sizes = [1, 128], strides = [1, 1]} : vector<8x128xf32> to vector<1x128xf32>
    %79 = vector.extract_strided_slice %34 {offsets = [0, 2], sizes = [8, 1], strides = [1, 1]} : vector<16x8xf32> to vector<8x1xf32>
    %80 = vector.broadcast %78 : vector<1x128xf32> to vector<8x128xf32>
    %81 = vector.broadcast %79 : vector<8x1xf32> to vector<8x128xf32>
    %82 = arith.mulf %80, %81 : vector<8x128xf32>
    %83 = vector.extract_strided_slice %35 {offsets = [3, 0], sizes = [1, 128], strides = [1, 1]} : vector<8x128xf32> to vector<1x128xf32>
    %84 = vector.extract_strided_slice %34 {offsets = [0, 3], sizes = [8, 1], strides = [1, 1]} : vector<16x8xf32> to vector<8x1xf32>
    %85 = vector.broadcast %83 : vector<1x128xf32> to vector<8x128xf32>
    %86 = vector.broadcast %84 : vector<8x1xf32> to vector<8x128xf32>
    %87 = arith.mulf %85, %86 : vector<8x128xf32>
    %88 = vector.extract_strided_slice %35 {offsets = [4, 0], sizes = [1, 128], strides = [1, 1]} : vector<8x128xf32> to vector<1x128xf32>
    %89 = vector.extract_strided_slice %34 {offsets = [0, 4], sizes = [8, 1], strides = [1, 1]} : vector<16x8xf32> to vector<8x1xf32>
    %90 = vector.broadcast %88 : vector<1x128xf32> to vector<8x128xf32>
    %91 = vector.broadcast %89 : vector<8x1xf32> to vector<8x128xf32>
    %92 = arith.mulf %90, %91 : vector<8x128xf32>
    %93 = vector.extract_strided_slice %35 {offsets = [5, 0], sizes = [1, 128], strides = [1, 1]} : vector<8x128xf32> to vector<1x128xf32>
    %94 = vector.extract_strided_slice %34 {offsets = [0, 5], sizes = [8, 1], strides = [1, 1]} : vector<16x8xf32> to vector<8x1xf32>
    %95 = vector.broadcast %93 : vector<1x128xf32> to vector<8x128xf32>
    %96 = vector.broadcast %94 : vector<8x1xf32> to vector<8x128xf32>
    %97 = arith.mulf %95, %96 : vector<8x128xf32>
    %98 = vector.extract_strided_slice %35 {offsets = [6, 0], sizes = [1, 128], strides = [1, 1]} : vector<8x128xf32> to vector<1x128xf32>
    %99 = vector.extract_strided_slice %34 {offsets = [0, 6], sizes = [8, 1], strides = [1, 1]} : vector<16x8xf32> to vector<8x1xf32>
    %100 = vector.broadcast %98 : vector<1x128xf32> to vector<8x128xf32>
    %101 = vector.broadcast %99 : vector<8x1xf32> to vector<8x128xf32>
    %102 = arith.mulf %100, %101 : vector<8x128xf32>
    %103 = vector.extract_strided_slice %35 {offsets = [7, 0], sizes = [1, 128], strides = [1, 1]} : vector<8x128xf32> to vector<1x128xf32>
    %104 = vector.extract_strided_slice %34 {offsets = [0, 7], sizes = [8, 1], strides = [1, 1]} : vector<16x8xf32> to vector<8x1xf32>
    %105 = vector.broadcast %103 : vector<1x128xf32> to vector<8x128xf32>
    %106 = vector.broadcast %104 : vector<8x1xf32> to vector<8x128xf32>
    %107 = arith.mulf %105, %106 : vector<8x128xf32>
    %108 = vector.extract_strided_slice %34 {offsets = [8, 0], sizes = [8, 1], strides = [1, 1]} : vector<16x8xf32> to vector<8x1xf32>
    %109 = vector.extract_strided_slice %34 {offsets = [8, 1], sizes = [8, 1], strides = [1, 1]} : vector<16x8xf32> to vector<8x1xf32>
    %110 = vector.extract_strided_slice %34 {offsets = [8, 2], sizes = [8, 1], strides = [1, 1]} : vector<16x8xf32> to vector<8x1xf32>
    %111 = vector.extract_strided_slice %34 {offsets = [8, 3], sizes = [8, 1], strides = [1, 1]} : vector<16x8xf32> to vector<8x1xf32>
    %112 = vector.extract_strided_slice %34 {offsets = [8, 4], sizes = [8, 1], strides = [1, 1]} : vector<16x8xf32> to vector<8x1xf32>
    %113 = vector.extract_strided_slice %34 {offsets = [8, 5], sizes = [8, 1], strides = [1, 1]} : vector<16x8xf32> to vector<8x1xf32>
    %114 = vector.extract_strided_slice %34 {offsets = [8, 6], sizes = [8, 1], strides = [1, 1]} : vector<16x8xf32> to vector<8x1xf32>
    %115 = vector.extract_strided_slice %34 {offsets = [8, 7], sizes = [8, 1], strides = [1, 1]} : vector<16x8xf32> to vector<8x1xf32>
    %116 = arith.mulf %39, %5 : vector<8x128xf32>
    %117 = arith.addf %116, %72 : vector<8x128xf32>
    %118 = vector.broadcast %108 : vector<8x1xf32> to vector<8x128xf32>
    %119 = arith.mulf %117, %118 : vector<8x128xf32>
    %cst_14 = arith.constant dense<0.000000e+00> : vector<128xf32>
    %120 = vector.multi_reduction <add>, %119, %cst_14 [0] : vector<8x128xf32> to vector<128xf32>
    %121 = vector.shape_cast %120 : vector<128xf32> to vector<1x128xf32>
    %122 = arith.mulf %43, %117 : vector<8x128xf32>
    %123 = arith.addf %122, %77 : vector<8x128xf32>
    %124 = vector.broadcast %109 : vector<8x1xf32> to vector<8x128xf32>
    %125 = arith.mulf %123, %124 : vector<8x128xf32>
    %cst_15 = arith.constant dense<0.000000e+00> : vector<128xf32>
    %126 = vector.multi_reduction <add>, %125, %cst_15 [0] : vector<8x128xf32> to vector<128xf32>
    %127 = vector.shape_cast %126 : vector<128xf32> to vector<1x128xf32>
    %128 = arith.mulf %47, %123 : vector<8x128xf32>
    %129 = arith.addf %128, %82 : vector<8x128xf32>
    %130 = vector.broadcast %110 : vector<8x1xf32> to vector<8x128xf32>
    %131 = arith.mulf %129, %130 : vector<8x128xf32>
    %cst_16 = arith.constant dense<0.000000e+00> : vector<128xf32>
    %132 = vector.multi_reduction <add>, %131, %cst_16 [0] : vector<8x128xf32> to vector<128xf32>
    %133 = vector.shape_cast %132 : vector<128xf32> to vector<1x128xf32>
    %134 = arith.mulf %51, %129 : vector<8x128xf32>
    %135 = arith.addf %134, %87 : vector<8x128xf32>
    %136 = vector.broadcast %111 : vector<8x1xf32> to vector<8x128xf32>
    %137 = arith.mulf %135, %136 : vector<8x128xf32>
    %cst_17 = arith.constant dense<0.000000e+00> : vector<128xf32>
    %138 = vector.multi_reduction <add>, %137, %cst_17 [0] : vector<8x128xf32> to vector<128xf32>
    %139 = vector.shape_cast %138 : vector<128xf32> to vector<1x128xf32>
    %140 = arith.mulf %55, %135 : vector<8x128xf32>
    %141 = arith.addf %140, %92 : vector<8x128xf32>
    %142 = vector.broadcast %112 : vector<8x1xf32> to vector<8x128xf32>
    %143 = arith.mulf %141, %142 : vector<8x128xf32>
    %cst_18 = arith.constant dense<0.000000e+00> : vector<128xf32>
    %144 = vector.multi_reduction <add>, %143, %cst_18 [0] : vector<8x128xf32> to vector<128xf32>
    %145 = vector.shape_cast %144 : vector<128xf32> to vector<1x128xf32>
    %146 = arith.mulf %59, %141 : vector<8x128xf32>
    %147 = arith.addf %146, %97 : vector<8x128xf32>
    %148 = vector.broadcast %113 : vector<8x1xf32> to vector<8x128xf32>
    %149 = arith.mulf %147, %148 : vector<8x128xf32>
    %cst_19 = arith.constant dense<0.000000e+00> : vector<128xf32>
    %150 = vector.multi_reduction <add>, %149, %cst_19 [0] : vector<8x128xf32> to vector<128xf32>
    %151 = vector.shape_cast %150 : vector<128xf32> to vector<1x128xf32>
    %152 = arith.mulf %63, %147 : vector<8x128xf32>
    %153 = arith.addf %152, %102 : vector<8x128xf32>
    %154 = vector.broadcast %114 : vector<8x1xf32> to vector<8x128xf32>
    %155 = arith.mulf %153, %154 : vector<8x128xf32>
    %cst_20 = arith.constant dense<0.000000e+00> : vector<128xf32>
    %156 = vector.multi_reduction <add>, %155, %cst_20 [0] : vector<8x128xf32> to vector<128xf32>
    %157 = vector.shape_cast %156 : vector<128xf32> to vector<1x128xf32>
    %158 = arith.mulf %67, %153 : vector<8x128xf32>
    %159 = arith.addf %158, %107 : vector<8x128xf32>
    %160 = vector.broadcast %115 : vector<8x1xf32> to vector<8x128xf32>
    %161 = arith.mulf %159, %160 : vector<8x128xf32>
    %cst_21 = arith.constant dense<0.000000e+00> : vector<128xf32>
    %162 = vector.multi_reduction <add>, %161, %cst_21 [0] : vector<8x128xf32> to vector<128xf32>
    %163 = vector.shape_cast %162 : vector<128xf32> to vector<1x128xf32>
    %164 = tpu.concatenate %121, %127, %133, %139, %145, %151, %157, %163 in 0 : vector<1x128xf32>, vector<1x128xf32>, vector<1x128xf32>, vector<1x128xf32>, vector<1x128xf32>, vector<1x128xf32>, vector<1x128xf32>, vector<1x128xf32> -> vector<8x128xf32>
    %165 = vector.broadcast %4 : vector<1x128xf32> to vector<8x128xf32>
    %166 = arith.mulf %165, %29 : vector<8x128xf32>
    %167 = arith.addf %164, %166 : vector<8x128xf32>
    %168 = arith.truncf %167 : vector<8x128xf32> to vector<8x128xbf16>
    %c0_22 = arith.constant 0 : index
    %169 = arith.index_cast %7 : i32 to index
    %c0_23 = arith.constant 0 : index
    %170 = vector.load %arg8[%c0_22, %169, %c0_23] : memref<1x8x128xbf16, #tpu.memory_space<vmem>>, vector<1x8x128xbf16>
    %171 = vector.shape_cast %170 : vector<1x8x128xbf16> to vector<8x128xbf16>
    %172 = vector.shape_cast %168 : vector<8x128xbf16> to vector<1x8x128xbf16>
    tpu.vector_store %arg8[%c0_22, %169, %c0_23], %172 {strides = array<i32>} : memref<1x8x128xbf16, #tpu.memory_space<vmem>>, vector<1x8x128xbf16>,
    %c1_i32 = arith.constant 1 : i32
    %c0_24 = arith.constant 0 : index
    %c0_25 = arith.constant 0 : index
    %173 = vector.load %arg9[%c0_24, %c0_25] : memref<8x128xf32, #tpu.memory_space<vmem>>, vector<8x128xf32>
    tpu.vector_store %arg9[%c0_24, %c0_25], %159 {strides = array<i32>} : memref<8x128xf32, #tpu.memory_space<vmem>>, vector<8x128xf32>,
    return
  }
  func.func @transform_0(%arg0: i32, %arg1: i32, %arg2: i32) -> (i32, i32, i32) {
    %c0_i32 = arith.constant 0 : i32
    return %arg0, %arg2, %arg1 : i32, i32, i32
  }
  func.func @transform_1(%arg0: i32, %arg1: i32, %arg2: i32) -> (i32, i32, i32) {
    %c0_i32 = arith.constant 0 : i32
    %c0_i32_0 = arith.constant 0 : i32
    return %arg0, %arg2, %c0_i32 : i32, i32, i32
  }
  func.func @transform_2(%arg0: i32, %arg1: i32, %arg2: i32) -> (i32, i32, i32) {
    %c0_i32 = arith.constant 0 : i32
    return %arg0, %arg2, %arg1 : i32, i32, i32
  }
  func.func @transform_3(%arg0: i32, %arg1: i32, %arg2: i32) -> (i32, i32) {
    %c0_i32 = arith.constant 0 : i32
    %c0_i32_0 = arith.constant 0 : i32
    return %c0_i32, %arg1 : i32, i32
  }
  func.func @transform_4(%arg0: i32, %arg1: i32, %arg2: i32) -> (i32, i32) {
    %c0_i32 = arith.constant 0 : i32
    %c0_i32_0 = arith.constant 0 : i32
    return %c0_i32, %arg1 : i32, i32
  }
  func.func @transform_5(%arg0: i32, %arg1: i32, %arg2: i32) -> (i32, i32, i32) {
    %c0_i32 = arith.constant 0 : i32
    return %arg0, %arg2, %arg1 : i32, i32, i32
  }
}

module attributes {stable_mosaic.version = 11 : i64} {
  func.func @_matmul_gated_kernel(%arg0: i32, %arg1: i32, %arg2: i32, %arg3: memref<16x128xbf16, #tpu.memory_space<vmem>>, %arg4: memref<16x128xbf16, #tpu.memory_space<vmem>>, %arg5: memref<128x128xbf16, #tpu.memory_space<vmem>>, %arg6: memref<1x128xf32, #tpu.memory_space<vmem>>, %arg7: memref<16x128xbf16, #tpu.memory_space<vmem>>, %arg8: memref<16x128xf32, #tpu.memory_space<vmem>>) attributes {dimension_semantics = [#tpu.dimension_semantics<parallel>, #tpu.dimension_semantics<parallel>, #tpu.dimension_semantics<arbitrary>], iteration_bounds = array<i64: 1, 1, 1>, scalar_prefetch = 0 : i64, scratch_operands = 1 : i64, tpu.core_type = #tpu.core_type<tc>, window_params = [{transform_indices = @transform_0, window_bounds = array<i64: 16, 128>}, {transform_indices = @transform_1, window_bounds = array<i64: 16, 128>}, {transform_indices = @transform_2, window_bounds = array<i64: 128, 128>}, {transform_indices = @transform_3, window_bounds = array<i64: 1, 128>}, {transform_indices = @transform_4, window_bounds = array<i64: 16, 128>}]} {
    %c0_i32 = arith.constant 0 : i32
    %0 = arith.cmpi eq, %arg2, %c0_i32 : i32
    %1 = arith.extui %0 : i1 to i32
    %c0_i32_0 = arith.constant 0 : i32
    %2 = arith.cmpi ne, %1, %c0_i32_0 : i32
    scf.if %2 {
      %cst_13 = arith.constant 0.000000e+00 : f32
      %23 = vector.broadcast %cst_13 : f32 to vector<16x128xf32>
      %c0_14 = arith.constant 0 : index
      %c0_15 = arith.constant 0 : index
      %24 = vector.load %arg8[%c0_14, %c0_15] : memref<16x128xf32, #tpu.memory_space<vmem>>, vector<16x128xf32>
      tpu.vector_store %arg8[%c0_14, %c0_15], %23 {strides = array<i32>} : memref<16x128xf32, #tpu.memory_space<vmem>>, vector<16x128xf32>,
    } else {
    }
    %c0 = arith.constant 0 : index
    %c0_1 = arith.constant 0 : index
    %3 = vector.load %arg4[%c0, %c0_1] : memref<16x128xbf16, #tpu.memory_space<vmem>>, vector<16x128xbf16>
    %4 = arith.extf %3 : vector<16x128xbf16> to vector<16x128xf32>
    %c0_2 = arith.constant 0 : index
    %c0_3 = arith.constant 0 : index
    %5 = vector.load %arg3[%c0_2, %c0_3] : memref<16x128xbf16, #tpu.memory_space<vmem>>, vector<16x128xbf16>
    %6 = arith.extf %5 : vector<16x128xbf16> to vector<16x128xf32>
    %7 = arith.negf %4 : vector<16x128xf32>
    %8 = math.exp %7 : vector<16x128xf32>
    %cst = arith.constant 1.000000e+00 : f32
    %9 = vector.broadcast %cst : f32 to vector<16x128xf32>
    %10 = arith.addf %9, %8 : vector<16x128xf32>
    %11 = arith.divf %9, %10 : vector<16x128xf32>
    %12 = arith.mulf %4, %11 : vector<16x128xf32>
    %13 = arith.mulf %6, %12 : vector<16x128xf32>
    %c0_4 = arith.constant 0 : index
    %c0_5 = arith.constant 0 : index
    %14 = vector.load %arg8[%c0_4, %c0_5] : memref<16x128xf32, #tpu.memory_space<vmem>>, vector<16x128xf32>
    %15 = arith.truncf %13 : vector<16x128xf32> to vector<16x128xbf16>
    %c0_6 = arith.constant 0 : index
    %c0_7 = arith.constant 0 : index
    %16 = vector.load %arg5[%c0_6, %c0_7] : memref<128x128xbf16, #tpu.memory_space<vmem>>, vector<128x128xbf16>
    %cst_8 = arith.constant dense<0.000000e+00> : vector<16x128xf32>
    %17 = tpu.matmul %15, %16, %cst_8 {dimension_numbers = #tpu.dot_dimension_numbers<[1], [0], [0], [1], [0, 0, 1, 1], [], []>} : vector<16x128xbf16>, vector<128x128xbf16>, vector<16x128xf32> -> vector<16x128xf32>
    %18 = arith.addf %14, %17 : vector<16x128xf32>
    %c0_9 = arith.constant 0 : index
    %c0_10 = arith.constant 0 : index
    %19 = vector.load %arg8[%c0_9, %c0_10] : memref<16x128xf32, #tpu.memory_space<vmem>>, vector<16x128xf32>
    tpu.vector_store %arg8[%c0_9, %c0_10], %18 {strides = array<i32>} : memref<16x128xf32, #tpu.memory_space<vmem>>, vector<16x128xf32>,
    %c0_i32_11 = arith.constant 0 : i32
    %20 = arith.cmpi eq, %arg2, %c0_i32_11 : i32
    %21 = arith.extui %20 : i1 to i32
    %c0_i32_12 = arith.constant 0 : i32
    %22 = arith.cmpi ne, %21, %c0_i32_12 : i32
    scf.if %22 {
      %c0_13 = arith.constant 0 : index
      %c0_14 = arith.constant 0 : index
      %23 = vector.load %arg8[%c0_13, %c0_14] : memref<16x128xf32, #tpu.memory_space<vmem>>, vector<16x128xf32>
      %c0_15 = arith.constant 0 : index
      %c0_16 = arith.constant 0 : index
      %24 = vector.load %arg6[%c0_15, %c0_16] : memref<1x128xf32, #tpu.memory_space<vmem>>, vector<1x128xf32>
      %25 = vector.broadcast %24 : vector<1x128xf32> to vector<16x128xf32>
      %26 = arith.addf %23, %25 : vector<16x128xf32>
      %27 = arith.truncf %26 : vector<16x128xf32> to vector<16x128xbf16>
      %c0_17 = arith.constant 0 : index
      %c0_18 = arith.constant 0 : index
      %28 = vector.load %arg7[%c0_17, %c0_18] : memref<16x128xbf16, #tpu.memory_space<vmem>>, vector<16x128xbf16>
      tpu.vector_store %arg7[%c0_17, %c0_18], %27 {strides = array<i32>} : memref<16x128xbf16, #tpu.memory_space<vmem>>, vector<16x128xbf16>,
    } else {
    }
    return
  }
  func.func @transform_0(%arg0: i32, %arg1: i32, %arg2: i32) -> (i32, i32) {
    %c0_i32 = arith.constant 0 : i32
    return %arg0, %arg2 : i32, i32
  }
  func.func @transform_1(%arg0: i32, %arg1: i32, %arg2: i32) -> (i32, i32) {
    %c0_i32 = arith.constant 0 : i32
    return %arg0, %arg2 : i32, i32
  }
  func.func @transform_2(%arg0: i32, %arg1: i32, %arg2: i32) -> (i32, i32) {
    %c0_i32 = arith.constant 0 : i32
    return %arg2, %arg1 : i32, i32
  }
  func.func @transform_3(%arg0: i32, %arg1: i32, %arg2: i32) -> (i32, i32) {
    %c0_i32 = arith.constant 0 : i32
    %c0_i32_0 = arith.constant 0 : i32
    return %c0_i32, %arg1 : i32, i32
  }
  func.func @transform_4(%arg0: i32, %arg1: i32, %arg2: i32) -> (i32, i32) {
    %c0_i32 = arith.constant 0 : i32
    return %arg0, %arg1 : i32, i32
  }
}

module attributes {stable_mosaic.version = 11 : i64} {
  func.func @_ln_matmul_kernel(%arg0: i32, %arg1: i32, %arg2: memref<16x128xbf16, #tpu.memory_space<vmem>>, %arg3: memref<1x128xf32, #tpu.memory_space<vmem>>, %arg4: memref<1x128xf32, #tpu.memory_space<vmem>>, %arg5: memref<128x128xbf16, #tpu.memory_space<vmem>>, %arg6: memref<1x128xf32, #tpu.memory_space<vmem>>, %arg7: memref<16x128xf32, #tpu.memory_space<vmem>>) attributes {dimension_semantics = [#tpu.dimension_semantics<parallel>, #tpu.dimension_semantics<parallel>], iteration_bounds = array<i64: 1, 1>, scalar_prefetch = 0 : i64, scratch_operands = 0 : i64, tpu.core_type = #tpu.core_type<tc>, window_params = [{transform_indices = @transform_0, window_bounds = array<i64: 16, 128>}, {pipeline_mode = #tpu.pipeline_mode<synchronous>, transform_indices = @transform_1, window_bounds = array<i64: 1, 128>}, {pipeline_mode = #tpu.pipeline_mode<synchronous>, transform_indices = @transform_2, window_bounds = array<i64: 1, 128>}, {transform_indices = @transform_3, window_bounds = array<i64: 128, 128>}, {transform_indices = @transform_4, window_bounds = array<i64: 1, 128>}, {transform_indices = @transform_5, window_bounds = array<i64: 16, 128>}]} {
    %c0 = arith.constant 0 : index
    %c0_0 = arith.constant 0 : index
    %0 = vector.load %arg2[%c0, %c0_0] : memref<16x128xbf16, #tpu.memory_space<vmem>>, vector<16x128xbf16>
    %1 = arith.extf %0 : vector<16x128xbf16> to vector<16x128xf32>
    %cst = arith.constant dense<0.000000e+00> : vector<16xf32>
    %2 = vector.multi_reduction <add>, %1, %cst [1] : vector<16x128xf32> to vector<16xf32>
    %3 = vector.shape_cast %2 : vector<16xf32> to vector<16x1xf32>
    %cst_1 = arith.constant 3.125000e-02 : f32
    %4 = vector.broadcast %cst_1 : f32 to vector<16x1xf32>
    %5 = arith.mulf %3, %4 : vector<16x1xf32>
    %6 = arith.mulf %1, %1 : vector<16x128xf32>
    %cst_2 = arith.constant dense<0.000000e+00> : vector<16xf32>
    %7 = vector.multi_reduction <add>, %6, %cst_2 [1] : vector<16x128xf32> to vector<16xf32>
    %8 = vector.shape_cast %7 : vector<16xf32> to vector<16x1xf32>
    %cst_3 = arith.constant 3.125000e-02 : f32
    %9 = vector.broadcast %cst_3 : f32 to vector<16x1xf32>
    %10 = arith.mulf %8, %9 : vector<16x1xf32>
    %11 = arith.mulf %5, %5 : vector<16x1xf32>
    %12 = arith.subf %10, %11 : vector<16x1xf32>
    %13 = vector.broadcast %5 : vector<16x1xf32> to vector<16x128xf32>
    %14 = arith.subf %1, %13 : vector<16x128xf32>
    %cst_4 = arith.constant 9.99999974E-6 : f32
    %15 = vector.broadcast %cst_4 : f32 to vector<16x1xf32>
    %16 = arith.addf %12, %15 : vector<16x1xf32>
    %17 = math.rsqrt %16 : vector<16x1xf32>
    %18 = vector.broadcast %17 : vector<16x1xf32> to vector<16x128xf32>
    %19 = arith.mulf %14, %18 : vector<16x128xf32>
    %c0_5 = arith.constant 0 : index
    %c0_6 = arith.constant 0 : index
    %20 = vector.load %arg3[%c0_5, %c0_6] : memref<1x128xf32, #tpu.memory_space<vmem>>, vector<1x128xf32>
    %21 = vector.broadcast %20 : vector<1x128xf32> to vector<16x128xf32>
    %22 = arith.mulf %19, %21 : vector<16x128xf32>
    %c0_7 = arith.constant 0 : index
    %c0_8 = arith.constant 0 : index
    %23 = vector.load %arg4[%c0_7, %c0_8] : memref<1x128xf32, #tpu.memory_space<vmem>>, vector<1x128xf32>
    %24 = vector.broadcast %23 : vector<1x128xf32> to vector<16x128xf32>
    %25 = arith.addf %22, %24 : vector<16x128xf32>
    %26 = arith.truncf %25 : vector<16x128xf32> to vector<16x128xbf16>
    %c0_9 = arith.constant 0 : index
    %c0_10 = arith.constant 0 : index
    %27 = vector.load %arg5[%c0_9, %c0_10] : memref<128x128xbf16, #tpu.memory_space<vmem>>, vector<128x128xbf16>
    %cst_11 = arith.constant dense<0.000000e+00> : vector<16x128xf32>
    %28 = tpu.matmul %26, %27, %cst_11 {dimension_numbers = #tpu.dot_dimension_numbers<[1], [0], [0], [1], [0, 0, 1, 1], [], []>} : vector<16x128xbf16>, vector<128x128xbf16>, vector<16x128xf32> -> vector<16x128xf32>
    %c0_12 = arith.constant 0 : index
    %c0_13 = arith.constant 0 : index
    %29 = vector.load %arg6[%c0_12, %c0_13] : memref<1x128xf32, #tpu.memory_space<vmem>>, vector<1x128xf32>
    %30 = vector.broadcast %29 : vector<1x128xf32> to vector<16x128xf32>
    %31 = arith.addf %28, %30 : vector<16x128xf32>
    %c0_14 = arith.constant 0 : index
    %c0_15 = arith.constant 0 : index
    %32 = vector.load %arg7[%c0_14, %c0_15] : memref<16x128xf32, #tpu.memory_space<vmem>>, vector<16x128xf32>
    tpu.vector_store %arg7[%c0_14, %c0_15], %31 {strides = array<i32>} : memref<16x128xf32, #tpu.memory_space<vmem>>, vector<16x128xf32>,
    return
  }
  func.func @transform_0(%arg0: i32, %arg1: i32) -> (i32, i32) {
    %c0_i32 = arith.constant 0 : i32
    %c0_i32_0 = arith.constant 0 : i32
    return %arg0, %c0_i32 : i32, i32
  }
  func.func @transform_1(%arg0: i32, %arg1: i32) -> (i32, i32) {
    %c0_i32 = arith.constant 0 : i32
    %c0_i32_0 = arith.constant 0 : i32
    %c0_i32_1 = arith.constant 0 : i32
    return %c0_i32, %c0_i32_0 : i32, i32
  }
  func.func @transform_2(%arg0: i32, %arg1: i32) -> (i32, i32) {
    %c0_i32 = arith.constant 0 : i32
    %c0_i32_0 = arith.constant 0 : i32
    %c0_i32_1 = arith.constant 0 : i32
    return %c0_i32, %c0_i32_0 : i32, i32
  }
  func.func @transform_3(%arg0: i32, %arg1: i32) -> (i32, i32) {
    %c0_i32 = arith.constant 0 : i32
    %c0_i32_0 = arith.constant 0 : i32
    return %c0_i32, %arg1 : i32, i32
  }
  func.func @transform_4(%arg0: i32, %arg1: i32) -> (i32, i32) {
    %c0_i32 = arith.constant 0 : i32
    %c0_i32_0 = arith.constant 0 : i32
    return %c0_i32, %arg1 : i32, i32
  }
  func.func @transform_5(%arg0: i32, %arg1: i32) -> (i32, i32) {
    %c0_i32 = arith.constant 0 : i32
    return %arg0, %arg1 : i32, i32
  }
}

</mosaic_0001>

<bundles_post_ra>
// kernel: forward.12
= control target key start
LH: loop header
LB: loop body
LE: loop exit
PB: predicated region body
PF: predicated region fallthrough
CT: control target
= control target key end

     0   :  { %s490_s12 = smov 0   ;;  %s492_s13 = smov 0   ;;  %s533_s0 = inlined_call_operand.vmem [shape: bf16[2,11,128], index: 0, kind: input, shape index: {}]   ;;  %s534_s1 = inlined_call_operand.vmem [shape: f32[4,128], index: 1, kind: input, shape index: {}]   ;;  %s535_s2 = inlined_call_operand.vmem [shape: f32[1,128], index: 2, kind: input, shape index: {}]   ;;  %s536_s3 = inlined_call_operand.vmem [shape: bf16[2,8,128], index: 3, kind: output, shape index: {}]  }
   0x1   :  { %s494_s14 = smov 0  }
   0x2 LB: > { %s25_s15 = sadd.s32 1, %s464_s13  ;;  %p409_p0 = scmp.ge.s32.totalorder %s468_s14, 1  ;;  %s468_s14 = sphi %s494_s14, %s13_s14   ;;  %s464_s13 = sphi %s492_s13, %s538_s13   ;;  %s460_s12 = sphi %s490_s12, %s537_s12  }
   0x3   : > { %p27_p1 = scmp.ge.s32.totalorder %s25_s15, 2  ;;  %p173_p2 = scmp.lt.s32.totalorder %s468_s14, 3 }
   0x5   : > { %s540_s15 = smov (%p27_p1, %s25_s15), 0  ;;  %p174_p3 = pnand %p409_p0, %p173_p2 }
   0x6   : > { %p209_p4 = scmp.lt.s32.totalorder (!%p174_p3), %s460_s12, 1 }
   0x7   : > { %177 = sbr.rel (%p174_p3) target bundleno = 64 (0x40), region = 32 }
   0xc   : > { %s542_s12 = smov (!%p209_p4, %s460_s12), 1  ;;  %v235_v0 = vld [vmem:[%s534_s1] sm:$0xf]  ;;  %vm243_vm0 = vcmask 1046528   ;;  %vm254_vm1 = vcmask 1045504   ;;  %vm265_vm2 = vcmask 1044480  }
   0xd   : > { %s416_s18 = sshll.u32 %s542_s12, 3  ;;  %v238_v1 = vperm.slane %v235_v0, 1  ;;  %v249_v2 = vperm.slane %v235_v0, 2  ;;  %v236_v5 = vperm.slane %v235_v0, 0  ;;  %v260_v6 = vperm.slane %v235_v0, 3  ;;  %s412_s24 = sshll.u32 %s542_s12, 2 }
   0xe   : > { %s216_s21 = scalar_lea.vmem %s533_s0, %s416_s18  ;;  %v441_v27 = vld [vmem:[%s535_s2] ss:$0 sm:$0xff]  ;;  %s230_s27 = scalar_lea.vmem %s536_s3, %s412_s24 }
   0xf   : > { %v231_v3 = vld [vmem:[%s216_s21] sm:$0xf]  ;;  %v232_v4 = vld [vmem:[%s216_s21 + $0x4] sm:$0x3] }
  0x10   : > { %v233_v7 = vunpack.c.l.bf16 %v231_v3  ;;  %v234_v8 = vunpack.c.l.bf16 %v232_v4 }
  0x12   : > { %v239_v9 = vmul.f32 %v238_v1, %v233_v7  ;;  %v240_v10 = vmul.f32 %v238_v1, %v234_v8  ;;  %v250_v11 = vmul.f32 %v249_v2, %v233_v7  ;;  %v237_v12 = vmul.f32 %v236_v5, %v233_v7 }
  0x13   : > { %v251_v13 = vmul.f32 %v249_v2, %v234_v8  ;;  %v261_v14 = vmul.f32 %v260_v6, %v233_v7  ;;  %v262_v15 = vmul.f32 %v260_v6, %v234_v8 }
  0x14   : > { %v244_v16 = vrot.slane %v239_v9, 1  ;;  %v245_v17 = vrot.slane %v240_v10, 1  ;;  %v255_v18 = vrot.slane %v250_v11, 2 }
  0x15   : > { %v256_v19 = vrot.slane %v251_v13, 2  ;;  %v266_v20 = vrot.slane %v261_v14, 3  ;;  %v267_v21 = vrot.slane %v262_v15, 3 }
  0x16   : > { %v246_v22 = vsel %vm243_vm0, %v244_v16, %v245_v17 }
  0x17   : > { %v248_v23 = vadd.f32 %v246_v22, %v237_v12  ;;  %v257_v24 = vsel %vm254_vm1, %v255_v18, %v256_v19  ;;  %v268_v25 = vsel %vm265_vm2, %v266_v20, %v267_v21 }
  0x19   : > { %v259_v26 = vadd.f32 %v257_v24, %v248_v23 }
  0x1b   : > { %v270_v28 = vadd.f32 %v268_v25, %v259_v26 }
  0x1d   : > { %v275_v29 = vadd.f32 %v441_v27, %v270_v28 }
  0x1f   : > { %v413_v30 = vmul.f32 -1.442695, %v275_v29 }
  0x21   : > { %442 = vpow2.f32 %v413_v30 }
  0x27   : > { %v443_v31 = vpop.eup %442 }
  0x28   : > { %v279_v32 = vadd.f32 1.0, %v443_v31 }
  0x2a   : > { %444 = vrcp.f32 %v279_v32  ;;  %v291_v35 = vand.u32 2147483648, %v279_v32  ;;  %vm285_vm3 = vweird.f32 %v279_v32  ;;  %v289_v37 = vand.u32 2147483647, %v279_v32 }
  0x2c   : > { %v292_v39 = vor.u32 1.1754944e-38, %v291_v35  ;;  %vm290_vm6 = vcmp.eq.f32.partialorder %v289_v37, 8.507059e+37 }
  0x30   : > { %v445_v33 = vpop.eup %444 }
  0x31   : > { %v281_v34 = vmul.f32 %v445_v33, %v279_v32  ;;  %vm286_vm4 = vweird.f32 %v445_v33 }
  0x32   : > { %vm287_vm5 = vmor %vm285_vm3, %vm286_vm4 }
  0x33   : > { %v282_v36 = vsub.f32 1.0, %v281_v34 }
  0x35   : > { %v283_v38 = vmul.f32 %v445_v33, %v282_v36 }
  0x37   : > { %v284_v40 = vadd.f32 %v445_v33, %v283_v38 }
  0x39   : > { %v288_v41 = vsel %vm287_vm5, %v445_v33, %v284_v40 }
  0x3a   : > { %v293_v42 = vsel %vm290_vm6, %v292_v39, %v288_v41 }
  0x3b   : > { %v295_v43 = vmul.f32 %v293_v42, %v275_v29 }
  0x3d   : > { %v296_v44 = vpack.c.bf16 %v295_v43, %v295_v43 }
  0x3f   : > { %297 = vst [vmem:[%s230_s27] sm:$0xf] %v296_v44 }
  0x40 PF: > { %s13_s14 = sadd.s32 1, %s468_s14   ;;  %s537_s12 = smov %s464_s13 }
  0x41   : > { %p10_p5 = scmp.ge.s32.totalorder %s13_s14, 4   ;;  %s538_s13 = smov %s540_s15 }
  0x43   :  { %12 = sbr.rel (!%p10_p5) target bundleno = 2 (0x2), region = 68 }

// kernel: forward.11
= control target key start
LH: loop header
LB: loop body
LE: loop exit
PB: predicated region body
PF: predicated region fallthrough
CT: control target
= control target key end

     0   :  { %s235_s1 = inlined_call_operand.vmem [shape: bf16[128,128], index: 1, kind: input, shape index: {}]   ;;  %s236_s2 = inlined_call_operand.vmem [shape: f32[1,128], index: 2, kind: input, shape index: {}]   ;;  %s237_s0 = inlined_call_operand.vmem [shape: bf16[16,128], index: 0, kind: input, shape index: {}]   ;;  %s238_s3 = inlined_call_operand.vmem [shape: bf16[16,128], index: 3, kind: output, shape index: {}]  }
   0x1   :  { %v175_v0 = vld [vmem:[%s235_s1 + $0x38] sm:$0xff]  ;;  %v174_v1 = vld [vmem:[%s235_s1 + $0x30] sm:$0xff]  ;;  %v173_v2 = vld [vmem:[%s235_s1 + $0x28] sm:$0xff] }
   0x2   :  { %94 = vmatpush.bf16.msra.mxu0 %v175_v0  ;;  %v172_v3 = vld [vmem:[%s235_s1 + $0x20] sm:$0xff]  ;;  %v171_v4 = vld [vmem:[%s235_s1 + $0x18] sm:$0xff]  ;;  %v170_v5 = vld [vmem:[%s235_s1 + $0x10] sm:$0xff] }
   0x3   :  { %v169_v6 = vld [vmem:[%s235_s1 + $0x8] sm:$0xff]  ;;  %v168_v7 = vld [vmem:[%s235_s1] sm:$0xff] }
   0x4   :  { %v167_v8 = vld [vmem:[%s237_s0] sm:$0xff] }
   0x5   :  { %v181_v10 = vld [vmem:[%s236_s2] ss:$0 sm:$0xff] }
   0x6   :  { %95 = vmatpush.bf16.msra.mxu0 %v174_v1 }
   0xa   :  { %96 = vmatpush.bf16.msra.mxu0 %v173_v2 }
   0xe   :  { %97 = vmatpush.bf16.msra.mxu0 %v172_v3 }
  0x12   :  { %98 = vmatpush.bf16.msra.mxu0 %v171_v4 }
  0x16   :  { %99 = vmatpush.bf16.msra.mxu0 %v170_v5 }
  0x1a   :  { %100 = vmatpush.bf16.msra.mxu0 %v169_v6 }
  0x1e   :  { %101 = vmatpush.bf16.msra.mxu0 %v168_v7 }
  0x21   :  { %102 = vmatmul.bf16.vlgmr.msra.gmra.mxu0 %v167_v8 }
  0x9e   :  { %v103_v9 = vpop.f32.mrf.mxu0 }
  0x9f   :  { %v121_v12 = vadd.f32 %v181_v10, %v103_v9 }
  0xa6   :  { %v105_v11 = vpop.f32.mrf.mxu0 }
  0xa7   :  { %v122_v13 = vadd.f32 %v181_v10, %v105_v11 }
  0xa9   :  { %v179_v14 = vpack.c.bf16 %v122_v13, %v121_v12 }
  0xab   :  { %180 = vst [vmem:[%s238_s3] sm:$0xff] %v179_v14  }

// kernel: forward.15
= control target key start
LH: loop header
LB: loop body
LE: loop exit
PB: predicated region body
PF: predicated region fallthrough
CT: control target
= control target key end

     0   :  { %s303_s2 = inlined_call_operand.vmem [shape: bf16[128,128], index: 2, kind: input, shape index: {}]   ;;  %s304_s1 = inlined_call_operand.vmem [shape: bf16[16,128], index: 1, kind: input, shape index: {}]   ;;  %s305_s3 = inlined_call_operand.vmem [shape: f32[1,128], index: 3, kind: input, shape index: {}]   ;;  %s306_s0 = inlined_call_operand.vmem [shape: bf16[16,128], index: 0, kind: input, shape index: {}]   ;;  %s307_s4 = inlined_call_operand.vmem [shape: bf16[16,128], index: 4, kind: output, shape index: {}]  }
   0x1   :  { %v218_v0 = vld [vmem:[%s303_s2 + $0x38] sm:$0xff]  ;;  %v217_v1 = vld [vmem:[%s303_s2 + $0x30] sm:$0xff]  ;;  %v220_v2 = vld [vmem:[%s304_s1] sm:$0xff]  }
   0x2   :  { %140 = vmatpush.bf16.msra.mxu0 %v218_v0  ;;  %v221_v3 = vunpack.c.l.bf16 %v220_v2  ;;  %v222_v4 = vunpack.c.h.bf16 %v220_v2  ;;  %v216_v7 = vld [vmem:[%s303_s2 + $0x28] sm:$0xff]  ;;  %v215_v8 = vld [vmem:[%s303_s2 + $0x20] sm:$0xff]  ;;  %v214_v11 = vld [vmem:[%s303_s2 + $0x18] sm:$0xff] }
   0x3   :  { %v213_v14 = vld [vmem:[%s303_s2 + $0x10] sm:$0xff]  ;;  %v212_v16 = vld [vmem:[%s303_s2 + $0x8] sm:$0xff]  ;;  %v211_v24 = vld [vmem:[%s303_s2] sm:$0xff] }
   0x4   :  { %v177_v5 = vmul.f32 -1.442695, %v221_v3  ;;  %v178_v6 = vmul.f32 -1.442695, %v222_v4  ;;  %v224_v28 = vld [vmem:[%s306_s0] sm:$0xff]  }
   0x5   :  { %v225_v34 = vunpack.c.l.bf16 %v224_v28  ;;  %v226_v36 = vunpack.c.h.bf16 %v224_v28  ;;  %v232_v46 = vld [vmem:[%s305_s3] ss:$0 sm:$0xff] }
   0x6   :  { %141 = vmatpush.bf16.msra.mxu0 %v217_v1  ;;  %233 = vpow2.f32 %v177_v5 }
   0x7   :  { %235 = vpow2.f32 %v178_v6 }
   0xa   :  { %142 = vmatpush.bf16.msra.mxu0 %v216_v7 }
   0xc   :  { %v234_v9 = vpop.eup %233 }
   0xd   :  { %v236_v10 = vpop.eup %235  ;;  %v37_v12 = vadd.f32 1.0, %v234_v9 }
   0xe   :  { %143 = vmatpush.bf16.msra.mxu0 %v215_v8  ;;  %v38_v13 = vadd.f32 1.0, %v236_v10 }
   0xf   :  { %237 = vrcp.f32 %v37_v12  ;;  %vm44_vm0 = vweird.f32 %v37_v12  ;;  %v50_v19 = vand.u32 2147483648, %v37_v12  ;;  %v48_v22 = vand.u32 2147483647, %v37_v12 }
  0x10   :  { %239 = vrcp.f32 %v38_v13  ;;  %v65_v23 = vand.u32 2147483648, %v38_v13  ;;  %vm59_vm2 = vweird.f32 %v38_v13  ;;  %v63_v26 = vand.u32 2147483647, %v38_v13 }
  0x11   :  { %v51_v29 = vor.u32 1.1754944e-38, %v50_v19  ;;  %vm49_vm5 = vcmp.eq.f32.partialorder %v48_v22, 8.507059e+37 }
  0x12   :  { %144 = vmatpush.bf16.msra.mxu0 %v214_v11  ;;  %v66_v32 = vor.u32 1.1754944e-38, %v65_v23  ;;  %vm64_vm7 = vcmp.eq.f32.partialorder %v63_v26, 8.507059e+37 }
  0x15   :  { %v238_v15 = vpop.eup %237 }
  0x16   :  { %145 = vmatpush.bf16.msra.mxu0 %v213_v14  ;;  %v240_v17 = vpop.eup %239  ;;  %v40_v18 = vmul.f32 %v238_v15, %v37_v12  ;;  %vm45_vm1 = vweird.f32 %v238_v15 }
  0x17   :  { %v55_v20 = vmul.f32 %v240_v17, %v38_v13  ;;  %vm60_vm3 = vweird.f32 %v240_v17  ;;  %vm46_vm4 = vmor %vm44_vm0, %vm45_vm1 }
  0x18   :  { %v41_v21 = vsub.f32 1.0, %v40_v18  ;;  %vm61_vm6 = vmor %vm59_vm2, %vm60_vm3 }
  0x19   :  { %v56_v25 = vsub.f32 1.0, %v55_v20 }
  0x1a   :  { %146 = vmatpush.bf16.msra.mxu0 %v212_v16  ;;  %v42_v27 = vmul.f32 %v238_v15, %v41_v21 }
  0x1b   :  { %v57_v30 = vmul.f32 %v240_v17, %v56_v25 }
  0x1c   :  { %v43_v31 = vadd.f32 %v238_v15, %v42_v27 }
  0x1d   :  { %v58_v33 = vadd.f32 %v240_v17, %v57_v30 }
  0x1e   :  { %147 = vmatpush.bf16.msra.mxu0 %v211_v24  ;;  %v47_v35 = vsel %vm46_vm4, %v238_v15, %v43_v31 }
  0x1f   :  { %v52_v37 = vsel %vm49_vm5, %v51_v29, %v47_v35  ;;  %v62_v38 = vsel %vm61_vm6, %v240_v17, %v58_v33 }
  0x20   :  { %v67_v39 = vsel %vm64_vm7, %v66_v32, %v62_v38  ;;  %v69_v40 = vmul.f32 %v221_v3, %v52_v37 }
  0x21   :  { %v70_v41 = vmul.f32 %v222_v4, %v67_v39 }
  0x22   :  { %v71_v42 = vmul.f32 %v225_v34, %v69_v40 }
  0x23   :  { %v72_v43 = vmul.f32 %v226_v36, %v70_v41 }
  0x25   :  { %v75_v44 = vpack.c.bf16 %v72_v43, %v71_v42 }
  0x27   :  { %148 = vmatmul.bf16.vlgmr.msra.gmra.mxu0 %v75_v44 }
  0xa4   :  { %v149_v45 = vpop.f32.mrf.mxu0 }
  0xa5   :  { %v167_v48 = vadd.f32 %v232_v46, %v149_v45 }
  0xac   :  { %v151_v47 = vpop.f32.mrf.mxu0 }
  0xad   :  { %v168_v49 = vadd.f32 %v232_v46, %v151_v47 }
  0xaf   :  { %v230_v50 = vpack.c.bf16 %v168_v49, %v167_v48 }
  0xb1   :  { %231 = vst [vmem:[%s307_s4] sm:$0xff] %v230_v50  }

// kernel: forward.14
= control target key start
LH: loop header
LB: loop body
LE: loop exit
PB: predicated region body
PF: predicated region fallthrough
CT: control target
= control target key end

     0   :  { %s977_s18 = smov 0   ;;  %s979_s19 = smov 0   ;;  %s1056_s0 = inlined_call_operand.vmem [shape: bf16[2,8,128], index: 0, kind: input, shape index: {}]   ;;  %s1057_s1 = inlined_call_operand.vmem [shape: bf16[2,8,16], index: 1, kind: input, shape index: {}]   ;;  %s1058_s2 = inlined_call_operand.vmem [shape: bf16[2,8,128], index: 2, kind: input, shape index: {}]   ;;  %s1059_s3 = inlined_call_operand.vmem [shape: f32[8,128], index: 3, kind: input, shape index: {}]   ;;  %s1060_s4 = inlined_call_operand.vmem [shape: f32[1,128], index: 4, kind: input, shape index: {}]   ;;  %s1061_s5 = inlined_call_operand.vmem [shape: bf16[2,8,128], index: 5, kind: output, shape index: {}]  }
   0x1   :  { %s981_s20 = smov 0  }
   0x2 LB: > { %s34_s21 = sadd.s32 1, %s933_s19  ;;  %p805_p0 = scmp.ge.s32.totalorder %s937_s20, 1  ;;  %s937_s20 = sphi %s981_s20, %s15_s20   ;;  %s933_s19 = sphi %s979_s19, %s1063_s19   ;;  %s929_s18 = sphi %s977_s18, %s1062_s18  }
   0x3   : > { %p36_p1 = scmp.ge.s32.totalorder %s34_s21, 2  ;;  %p269_p2 = scmp.lt.s32.totalorder %s937_s20, 3 }
   0x5   : > { %s1065_s21 = smov (%p36_p1, %s34_s21), 0  ;;  %p270_p3 = pnand %p805_p0, %p269_p2 }
   0x6   : > { %p331_p4 = scmp.lt.s32.totalorder (!%p270_p3), %s929_s18, 1 }
   0x7   : > { %273 = sbr.rel (%p270_p3) target bundleno = 363 (0x16b), region = 40 }
   0xc   : > { %s1067_s18 = smov (!%p331_p4, %s929_s18), 1  ;;  %v939_v2 = vmov 3   ;;  %v940_v3 = vmov 1   ;;  %v941_v4 = vmov 0   ;;  %v942_v8 = vmov 4   ;;  %v380_v31 = vld [vmem:[%s1059_s3] sm:$0xff] }
   0xd   : > { %s995_s22 = sshll.u32 %s1067_s18, 2  ;;  %863 = vset.pattern.permute.xlu2 %v939_v2  ;;  %851 = vset.pattern.permute.xlu1 %v940_v3  ;;  %v943_v9 = vmov 2   ;;  %v944_v10 = vmov 7   ;;  %v945_v11 = vmov 6   ;;  %v946_v12 = vmov 5  }
   0xe   : > { %s347_s25 = scalar_lea.vmem %s1057_s1, %s995_s22  ;;  %s340_s28 = scalar_lea.vmem %s1056_s0, %s995_s22  ;;  %vm626_vm2 = vcmask 1040384   ;;  %vm628_vm3 = vcmask 1041408   ;;  %vm630_vm4 = vcmask 1042432   ;;  %vm632_vm5 = vcmask 1043456  }
   0xf   : > { %v405_v0 = vld [vmem:[%s347_s25] sm:$0xf]  ;;  %s357_s8 = scalar_lea.vmem %s1058_s2, %s995_s22  ;;  %vm634_vm6 = vcmask 1044480   ;;  %vm636_vm7 = vcmask 1045504   ;;  %vm638_vm8 = vcmask 1046528   ;;  %s374_s13 = scalar_lea.vmem %s1061_s5, %s995_s22 }
  0x10   : > { %v406_v1 = vunpack.c.l.bf16 %v405_v0  ;;  %v383_v13 = vld [vmem:[%s340_s28] sm:$0xf] }
  0x11   : > { %v384_v14 = vunpack.c.l.bf16 %v383_v13  ;;  %v1016_v35 = vld [vmem:[%s357_s8] sm:$0xf] }
  0x12   : > { %407 = vxpose.xlu0.b32.start.end [1/1] (short) (narrow) %v406_v1, 16  ;;  %v404_v38 = vunpack.c.l.bf16 %v1016_v35 }
  0x13   : > { %v388_v15 = vand.u32 2147483647, %v384_v14  ;;  %v385_v26 = vmax.f32 %v384_v14, 0.0  ;;  %vm386_vm1 = vcmp.ne.f32.partialorder %v384_v14, %v384_v14 }
  0x15   : > { %v389_v16 = vsub.f32 0.0, %v388_v15 }
  0x17   : > { %v390_v17 = vmul.f32 1.442695, %v389_v16 }
  0x19   : > { %895 = vpow2.f32 %v390_v17 }
  0x1f   : > { %v896_v18 = vpop.eup %895 }
  0x20   : > { %v392_v19 = vadd.f32 1.0, %v896_v18  ;;  %v395_v20 = vmul.f32 -0.5, %v896_v18  ;;  %v398_v23 = vand.u32 2147483647, %v896_v18 }
  0x22   : > { %897 = vlog2.f32 %v392_v19  ;;  %v396_v21 = vadd.f32 1.0, %v395_v20  ;;  %vm399_vm0 = vcmp.lt.f32.partialorder %v398_v23, 0.0004427343 }
  0x24   : > { %v397_v25 = vmul.f32 %v896_v18, %v396_v21 }
  0x28   : > { %v898_v22 = vpop.eup %897 }
  0x29   : > { %v394_v24 = vmul.f32 0.6931472, %v898_v22 }
  0x2b   : > { %v400_v27 = vsel %vm399_vm0, %v397_v25, %v394_v24 }
  0x2c   : > { %v401_v28 = vadd.f32 %v400_v27, %v385_v26 }
  0x2e   : > { %v1005_v29 = vsel %vm386_vm1, %v384_v14, %v401_v28 }
  0x2f   : > { %v440_v30 = vperm.slane %v1005_v29, 0  ;;  %v444_v33 = vperm.slane %v1005_v29, 1  ;;  %v448_v37 = vperm.slane %v1005_v29, 2  ;;  %v452_v41 = vperm.slane %v1005_v29, 3 }
  0x30   : > { %v1024_v42 = vmul.f32 %v404_v38, %v1005_v29  ;;  %v456_v48 = vperm.slane %v1005_v29, 4  ;;  %v460_v54 = vperm.slane %v1005_v29, 5  ;;  %v464_v62 = vperm.slane %v1005_v29, 6 }
  0x31   : > { %v441_v32 = vmul.f32 %v440_v30, %v380_v31  ;;  %v445_v36 = vmul.f32 %v444_v33, %v380_v31  ;;  %v449_v40 = vmul.f32 %v448_v37, %v380_v31  ;;  %v453_v45 = vmul.f32 %v452_v41, %v380_v31 }
  0x32   : > { %v472_v47 = vperm.slane %v1024_v42, 0  ;;  %v479_v56 = vperm.slane %v1024_v42, 1  ;;  %v457_v58 = vmul.f32 %v456_v48, %v380_v31  ;;  %v461_v61 = vmul.f32 %v460_v54, %v380_v31 }
  0x33   : > { %v442_v34 = vmul.f32 1.442695, %v441_v32  ;;  %v446_v39 = vmul.f32 1.442695, %v445_v36  ;;  %v450_v44 = vmul.f32 1.442695, %v449_v40 }
  0x34   : > { %v454_v53 = vmul.f32 1.442695, %v453_v45  ;;  %v485_v1 = vperm.slane %v1024_v42, 2  ;;  %v458_v2 = vmul.f32 1.442695, %v457_v58  ;;  %v497_v26 = vperm.slane %v1024_v42, 4 }
  0x35   : > { %899 = vpow2.f32 %v442_v34 }
  0x36   : > { %901 = vpow2.f32 %v446_v39 }
  0x37   : > { %903 = vpow2.f32 %v450_v44 }
  0x38   : > { %905 = vpow2.f32 %v454_v53 }
  0x39   : > { %907 = vpow2.f32 %v458_v2  ;;  %v515_v2 = vperm.slane %v1024_v42, 7 }
  0x3b   : > { %v900_v43 = vpop.eup %899 }
  0x3c   : > { %v521_v52 = vmul.f32 0.0, %v900_v43  ;;  %v902_v59 = vpop.eup %901  ;;  %v503_v43 = vperm.slane %v1024_v42, 5 }
  0x3d   : > { %v904_v3 = vpop.eup %903 }
  0x3e   : > { %v906_v15 = vpop.eup %905 }
  0x3f   : > { %v908_v27 = vpop.eup %907 }
  0x79   : > { %845 = vset.pattern.permute.xlu0 %v941_v4 }
  0xb6   : > { %v423_v5 = vpop.trf.xlu0 }
  0xbe   : > { %v424_v6 = vpop.trf.xlu0 }
  0xbf   : > { %v864_v7 = vpack.i.bf16 %v424_v6, %v423_v5  ;;  %v491_v5 = vperm.slane %v1024_v42, 3 }
  0xc1   : > { %865 = vperm.xlu2 %863, %v864_v7   ;;  %853 = vperm.xlu1 %851, %v864_v7  }
  0xc2   : > { %847 = vperm.xlu0 %845, %v864_v7  }
  0xc9   : > { %869 = vset.pattern.permute.xlu2 %v942_v8  ;;  %857 = vset.pattern.permute.xlu1 %v943_v9 }
  0xca   : > { %871 = vperm.xlu2 %869, %v864_v7   ;;  %859 = vperm.xlu1 %857, %v864_v7  }
  0xcb   : > { %893 = vset.pattern.permute.xlu0 %v944_v10 }
  0xd2   : > { %881 = vset.pattern.permute.xlu2 %v945_v11  ;;  %875 = vset.pattern.permute.xlu1 %v946_v12  ;;  %v465_v11 = vmul.f32 %v464_v62, %v380_v31  ;;  %v468_v12 = vperm.slane %v1005_v29, 7 }
  0xd3   : > { %883 = vperm.xlu2 %881, %v864_v7   ;;  %877 = vperm.xlu1 %875, %v864_v7  }
  0xd4   : > { %v466_v19 = vmul.f32 1.442695, %v465_v11  ;;  %v469_v20 = vmul.f32 %v468_v12, %v380_v31 }
  0xd6   : > { %v470_v37 = vmul.f32 1.442695, %v469_v20 }
  0xdb   : > { %887 = vset.pattern.permute.xlu1 %v944_v10  ;;  %v462_v10 = vmul.f32 1.442695, %v461_v61 }
  0xdc   : > { %889 = vperm.xlu1 %887, %v864_v7  }
  0xdd   : > { %909 = vpow2.f32 %v462_v10 }
  0xde   : > { %911 = vpow2.f32 %v466_v19 }
  0xdf   : > { %913 = vpow2.f32 %v470_v37 }
  0xe3   : > { %v910_v39 = vpop.eup %909 }
 0x11b   : > { %v866_v49 = vpop.permute.xlu2 %865 }
 0x11c   : > { %v867_v8 = vunpack.i.l.bf16 %v866_v49  ;;  %v868_v28 = vunpack.i.h.bf16 %v866_v49 }
 0x11e   : > { %v496_v18 = vmul.f32 %v867_v8, %v491_v5 }
 0x124   : > { %v872_v9 = vpop.permute.xlu2 %871 }
 0x125   : > { %v873_v25 = vunpack.i.l.bf16 %v872_v9  ;;  %v874_v48 = vunpack.i.h.bf16 %v872_v9 }
 0x127   : > { %v502_v40 = vmul.f32 %v873_v25, %v497_v26 }
 0x12d   : > { %v884_v31 = vpop.permute.xlu2 %883 }
 0x12e   : > { %v886_v11 = vunpack.i.h.bf16 %v884_v31 }
 0x133   : > { %v854_v46 = vpop.permute.xlu1 %853 }
 0x134   : > { %v848_v50 = vpop.permute.xlu0 %847  ;;  %v855_v55 = vunpack.i.l.bf16 %v854_v46  ;;  %v856_v16 = vunpack.i.h.bf16 %v854_v46 }
 0x135   : > { %v849_v51 = vunpack.i.l.bf16 %v848_v50  ;;  %v850_v21 = vunpack.i.h.bf16 %v848_v50  ;;  %v885_v50 = vunpack.i.l.bf16 %v884_v31 }
 0x136   : > { %v484_v63 = vmul.f32 %v855_v55, %v479_v56  ;;  %v912_v56 = vpop.eup %911 }
 0x137   : > { %v478_v57 = vmul.f32 %v849_v51, %v472_v47  ;;  %v509_v51 = vperm.slane %v1024_v42, 6 }
 0x139   : > { %v522_v60 = vadd.f32 %v521_v52, %v478_v57 }
 0x13b   : > { %v535_v0 = vmul.f32 %v902_v59, %v522_v60  ;;  %v528_v29 = vmul.f32 %v850_v21, %v522_v60 }
 0x13c   : > { %v860_v4 = vpop.permute.xlu1 %859 }
 0x13d   : > { %v536_v6 = vadd.f32 %v535_v0, %v484_v63  ;;  %v861_v7 = vunpack.i.l.bf16 %v860_v4  ;;  %v862_v23 = vunpack.i.h.bf16 %v860_v4  ;;  %v529_v45 = vrot.slane %v528_v29, 4 }
 0x13e   : > { %v514_v0 = vmul.f32 %v885_v50, %v509_v51 }
 0x13f   : > { %v490_v13 = vmul.f32 %v861_v7, %v485_v1  ;;  %v548_v14 = vmul.f32 %v904_v3, %v536_v6  ;;  %v541_v22 = vmul.f32 %v856_v16, %v536_v6  ;;  %v530_v57 = vadd.f32 %v529_v45, %v528_v29  ;;  %v914_v7 = vpop.eup %913 }
 0x141   : > { %v549_v17 = vadd.f32 %v548_v14, %v490_v13  ;;  %v542_v34 = vrot.slane %v541_v22, 4  ;;  %v531_v8 = vrot.slane %v530_v57, 2 }
 0x143   : > { %v561_v24 = vmul.f32 %v906_v15, %v549_v17  ;;  %v554_v30 = vmul.f32 %v862_v23, %v549_v17  ;;  %v543_v52 = vadd.f32 %v542_v34, %v541_v22  ;;  %v532_v20 = vadd.f32 %v531_v8, %v530_v57 }
 0x145   : > { %v562_v32 = vadd.f32 %v561_v24, %v496_v18  ;;  %v878_v33 = vpop.permute.xlu1 %877  ;;  %v555_v46 = vrot.slane %v554_v30, 4  ;;  %v544_v1 = vrot.slane %v543_v52, 2 }
 0x146   : > { %v879_v41 = vunpack.i.l.bf16 %v878_v33  ;;  %v880_v60 = vunpack.i.h.bf16 %v878_v33  ;;  %v533_v33 = vrot.slane %v532_v20, 1 }
 0x147   : > { %v567_v36 = vmul.f32 %v868_v28, %v562_v32  ;;  %v574_v44 = vmul.f32 %v908_v27, %v562_v32  ;;  %v556_v58 = vadd.f32 %v555_v46, %v554_v30  ;;  %v545_v14 = vadd.f32 %v544_v1, %v543_v52 }
 0x148   : > { %v508_v53 = vmul.f32 %v879_v41, %v503_v43  ;;  %v534_v45 = vadd.f32 %v533_v33, %v532_v20 }
 0x149   : > { %v568_v47 = vrot.slane %v567_v36, 4  ;;  %v575_v49 = vadd.f32 %v574_v44, %v502_v40  ;;  %v557_v9 = vrot.slane %v556_v58, 2  ;;  %v546_v27 = vrot.slane %v545_v14, 1 }
 0x14b   : > { %v580_v54 = vmul.f32 %v874_v48, %v575_v49  ;;  %v587_v55 = vmul.f32 %v910_v39, %v575_v49  ;;  %v569_v59 = vadd.f32 %v568_v47, %v567_v36  ;;  %v558_v21 = vadd.f32 %v557_v9, %v556_v58  ;;  %v894_v49 = vld [vmem:[%s1060_s4] ss:$0 sm:$0xff] }
 0x14c   : > { %v547_v40 = vadd.f32 %v546_v27, %v545_v14  ;;  %v643_v58 = vmul.f32 %v894_v49, %v404_v38 }
 0x14d   : > { %v581_v61 = vrot.slane %v580_v54, 4  ;;  %v588_v62 = vadd.f32 %v587_v55, %v508_v53  ;;  %v570_v10 = vrot.slane %v569_v59, 2  ;;  %v559_v32 = vrot.slane %v558_v21, 1 }
 0x14e   : > { %v890_v63 = vpop.permute.xlu1 %889  ;;  %v627_v51 = vsel %vm626_vm2, %v534_v45, %v547_v40 }
 0x14f   : > { %v582_v3 = vadd.f32 %v581_v61, %v580_v54  ;;  %v593_v4 = vmul.f32 %v880_v60, %v588_v62  ;;  %v600_v5 = vmul.f32 %v912_v56, %v588_v62  ;;  %v891_v6 = vunpack.i.l.bf16 %v890_v63 }
 0x150   : > { %v571_v42 = vadd.f32 %v570_v10, %v569_v59  ;;  %v892_v23 = vunpack.i.h.bf16 %v890_v63  ;;  %v560_v44 = vadd.f32 %v559_v32, %v558_v21 }
 0x151   : > { %v594_v12 = vrot.slane %v593_v4, 4  ;;  %v601_v13 = vadd.f32 %v600_v5, %v514_v0  ;;  %v583_v15 = vrot.slane %v582_v3, 2  ;;  %v520_v17 = vmul.f32 %v891_v6, %v515_v2 }
 0x152   : > { %v572_v34 = vrot.slane %v571_v42, 1  ;;  %v629_v54 = vsel %vm628_vm3, %v627_v51, %v560_v44 }
 0x153   : > { %v595_v16 = vadd.f32 %v594_v12, %v593_v4  ;;  %v606_v18 = vmul.f32 %v886_v11, %v601_v13  ;;  %v613_v19 = vmul.f32 %v914_v7, %v601_v13  ;;  %v584_v26 = vadd.f32 %v583_v15, %v582_v3 }
 0x154   : > { %v573_v46 = vadd.f32 %v572_v34, %v571_v42 }
 0x155   : > { %v596_v22 = vrot.slane %v595_v16, 2  ;;  %v607_v24 = vrot.slane %v606_v18, 4  ;;  %v614_v25 = vadd.f32 %v613_v19, %v520_v17  ;;  %v585_v39 = vrot.slane %v584_v26, 1 }
 0x156   : > { %v631_v56 = vsel %vm630_vm4, %v629_v54, %v573_v46 }
 0x157   : > { %v597_v28 = vadd.f32 %v596_v22, %v595_v16  ;;  %v608_v29 = vadd.f32 %v607_v24, %v606_v18  ;;  %v619_v30 = vmul.f32 %v892_v23, %v614_v25  ;;  %v586_v50 = vadd.f32 %v585_v39, %v584_v26 }
 0x159   : > { %v609_v36 = vrot.slane %v608_v29, 2  ;;  %v620_v37 = vrot.slane %v619_v30, 4  ;;  %v598_v31 = vrot.slane %v597_v28, 1  ;;  %v633_v59 = vsel %vm632_vm5, %v631_v56, %v586_v50 }
 0x15b   : > { %v610_v41 = vadd.f32 %v609_v36, %v608_v29  ;;  %v621_v43 = vadd.f32 %v620_v37, %v619_v30  ;;  %v599_v52 = vadd.f32 %v598_v31, %v597_v28 }
 0x15d   : > { %v611_v47 = vrot.slane %v610_v41, 1  ;;  %v622_v48 = vrot.slane %v621_v43, 2  ;;  %v635_v60 = vsel %vm634_vm6, %v633_v59, %v599_v52 }
 0x15f   : > { %v623_v53 = vadd.f32 %v622_v48, %v621_v43  ;;  %v612_v55 = vadd.f32 %v611_v47, %v610_v41 }
 0x161   : > { %v624_v57 = vrot.slane %v623_v53, 1  ;;  %v637_v62 = vsel %vm636_vm7, %v635_v60, %v612_v55 }
 0x163   : > { %v625_v61 = vadd.f32 %v624_v57, %v623_v53 }
 0x165   : > { %v639_v63 = vsel %vm638_vm8, %v637_v62, %v625_v61 }
 0x166   : > { %v644_v0 = vadd.f32 %v643_v58, %v639_v63 }
 0x168   : > { %v645_v1 = vpack.c.bf16 %v644_v0, %v644_v0 }
 0x16a   : > { %646 = vst [vmem:[%s374_s13] sm:$0xf] %v645_v1 }
 0x16b PF: > { %s15_s20 = sadd.s32 1, %s937_s20   ;;  %s1062_s18 = smov %s933_s19 }
 0x16c   : > { %p12_p5 = scmp.ge.s32.totalorder %s15_s20, 4   ;;  %s1063_s19 = smov %s1065_s21 }
 0x16e   :  { %14 = sbr.rel (!%p12_p5) target bundleno = 2 (0x2), region = 86 }

// kernel: forward.21
= control target key start
LH: loop header
LB: loop body
LE: loop exit
PB: predicated region body
PF: predicated region fallthrough
CT: control target
= control target key end

     0   :  { %s298_s0 = inlined_call_operand.vmem [shape: bf16[16,128], index: 0, kind: input, shape index: {}]   ;;  %s299_s1 = inlined_call_operand.vmem [shape: f32[1,128], index: 1, kind: input, shape index: {}]   ;;  %s300_s2 = inlined_call_operand.vmem [shape: f32[1,128], index: 2, kind: input, shape index: {}]   ;;  %s301_s4 = inlined_call_operand.vmem [shape: f32[1,128], index: 4, kind: input, shape index: {}]   ;;  %s302_s3 = inlined_call_operand.vmem [shape: bf16[128,128], index: 3, kind: input, shape index: {}]   ;;  %s303_s5 = inlined_call_operand.vmem [shape: f32[16,128], index: 5, kind: output, shape index: {}]  }
   0x1   :  { %v210_v0 = vld [vmem:[%s298_s0] sm:$0xff]   ;;  %v208_v5 = vld [vmem:[%s302_s3 + $0x38] sm:$0xff]  ;;  %v207_v6 = vld [vmem:[%s302_s3 + $0x30] sm:$0xff] }
   0x2   :  { %v211_v1 = vunpack.c.l.bf16 %v210_v0  ;;  %v253_v3 = vunpack.c.h.bf16 %v210_v0  ;;  %149 = vmatpush.bf16.msra.mxu0 %v208_v5  ;;  %v206_v7 = vld [vmem:[%s302_s3 + $0x28] sm:$0xff]  ;;  %v205_v8 = vld [vmem:[%s302_s3 + $0x20] sm:$0xff]  ;;  %v204_v9 = vld [vmem:[%s302_s3 + $0x18] sm:$0xff] }
   0x3   :  { %v203_v10 = vld [vmem:[%s302_s3 + $0x10] sm:$0xff]  ;;  %v202_v12 = vld [vmem:[%s302_s3 + $0x8] sm:$0xff]  ;;  %v201_v17 = vld [vmem:[%s302_s3] sm:$0xff] }
   0x4   :  { %24 = vadd.xlane.f32.xlu0 %v211_v1  ;;  %v30_v2 = vmul.f32 %v211_v1, %v211_v1  ;;  %v31_v4 = vmul.f32 %v253_v3, %v253_v3  ;;  %v213_v41 = vld [vmem:[%s299_s1] ss:$0 sm:$0xff] }
   0x5   :  { %v214_v47 = vld [vmem:[%s300_s2] ss:$0 sm:$0xff] }
   0x6   :  { %32 = vadd.xlane.f32.xlu1 %v30_v2  ;;  %150 = vmatpush.bf16.msra.mxu0 %v207_v6  ;;  %v215_v52 = vld [vmem:[%s301_s4] ss:$0 sm:$0xff] }
   0xa   :  { %151 = vmatpush.bf16.msra.mxu0 %v206_v7 }
   0xc   :  { %26 = vadd.xlane.f32.xlu0 %v253_v3 }
   0xe   :  { %34 = vadd.xlane.f32.xlu1 %v31_v4  ;;  %152 = vmatpush.bf16.msra.mxu0 %v205_v8 }
  0x12   :  { %153 = vmatpush.bf16.msra.mxu0 %v204_v9 }
  0x16   :  { %154 = vmatpush.bf16.msra.mxu0 %v203_v10 }
  0x1a   :  { %155 = vmatpush.bf16.msra.mxu0 %v202_v12 }
  0x1e   :  { %156 = vmatpush.bf16.msra.mxu0 %v201_v17 }
  0x77   :  { %v25_v11 = vpop.xlane.xlu0 %24 }
  0x78   :  { %v28_v13 = vmul.f32 0.03125, %v25_v11 }
  0x79   :  { %v33_v14 = vpop.xlane.xlu1 %32 }
  0x7a   :  { %v38_v15 = vmul.f32 %v28_v13, %v28_v13  ;;  %v36_v16 = vmul.f32 0.03125, %v33_v14  ;;  %v42_v38 = vsub.f32 %v211_v1, %v28_v13 }
  0x7c   :  { %v40_v18 = vsub.f32 %v36_v16, %v38_v15 }
  0x7e   :  { %v44_v19 = vadd.f32 1e-05, %v40_v18 }
  0x7f   :  { %v27_v20 = vpop.xlane.xlu0 %26 }
  0x80   :  { %216 = vrsqrt.f32 %v44_v19  ;;  %v29_v21 = vmul.f32 0.03125, %v27_v20  ;;  %vm52_vm1 = vweird.f32 %v44_v19 }
  0x81   :  { %v35_v22 = vpop.xlane.xlu1 %34 }
  0x82   :  { %v39_v23 = vmul.f32 %v29_v21, %v29_v21  ;;  %v37_v24 = vmul.f32 0.03125, %v35_v22  ;;  %v43_v43 = vsub.f32 %v253_v3, %v29_v21 }
  0x84   :  { %v41_v25 = vsub.f32 %v37_v24, %v39_v23 }
  0x86   :  { %v217_v26 = vpop.eup %216  ;;  %v45_v27 = vadd.f32 1e-05, %v41_v25 }
  0x87   :  { %v47_v28 = vmul.f32 %v217_v26, %v44_v19  ;;  %vm53_vm0 = vweird.f32 %v217_v26 }
  0x88   :  { %218 = vrsqrt.f32 %v45_v27  ;;  %vm54_vm2 = vmor %vm52_vm1, %vm53_vm0  ;;  %vm62_vm4 = vweird.f32 %v45_v27 }
  0x89   :  { %v48_v29 = vmul.f32 %v217_v26, %v47_v28 }
  0x8b   :  { %v49_v30 = vmul.f32 0.5, %v48_v29 }
  0x8d   :  { %v50_v31 = vsub.f32 1.5, %v49_v30 }
  0x8e   :  { %v219_v32 = vpop.eup %218 }
  0x8f   :  { %v51_v33 = vmul.f32 %v217_v26, %v50_v31  ;;  %v57_v34 = vmul.f32 %v219_v32, %v45_v27  ;;  %vm63_vm3 = vweird.f32 %v219_v32 }
  0x90   :  { %vm64_vm5 = vmor %vm62_vm4, %vm63_vm3 }
  0x91   :  { %v58_v35 = vmul.f32 %v219_v32, %v57_v34  ;;  %v55_v37 = vsel %vm54_vm2, %v217_v26, %v51_v33 }
  0x92   :  { %v66_v40 = vmul.f32 %v55_v37, %v42_v38 }
  0x93   :  { %v59_v36 = vmul.f32 0.5, %v58_v35 }
  0x94   :  { %v72_v46 = vmul.f32 %v213_v41, %v66_v40 }
  0x95   :  { %v60_v39 = vsub.f32 1.5, %v59_v36 }
  0x96   :  { %v78_v49 = vadd.f32 %v214_v47, %v72_v46 }
  0x97   :  { %v61_v42 = vmul.f32 %v219_v32, %v60_v39 }
  0x99   :  { %v65_v44 = vsel %vm64_vm5, %v219_v32, %v61_v42 }
  0x9a   :  { %v67_v45 = vmul.f32 %v65_v44, %v43_v43 }
  0x9c   :  { %v73_v48 = vmul.f32 %v213_v41, %v67_v45 }
  0x9e   :  { %v79_v50 = vadd.f32 %v214_v47, %v73_v48 }
  0xa0   :  { %v80_v51 = vpack.c.bf16 %v79_v50, %v78_v49 }
  0xa2   :  { %157 = vmatmul.bf16.vlgmr.msra.gmra.mxu0 %v80_v51 }
 0x11f   :  { %v158_v53 = vpop.f32.mrf.mxu0 }
 0x120   :  { %v159_v54 = vadd.f32 %v215_v52, %v158_v53 }
 0x122   :  { %163 = vst [vmem:[%s303_s5] sm:$0xff] %v159_v54 }
 0x127   :  { %v160_v55 = vpop.f32.mrf.mxu0 }
 0x128   :  { %v161_v56 = vadd.f32 %v215_v52, %v160_v55 }
 0x12a   :  { %164 = vst [vmem:[%s303_s5 + $0x8] sm:$0xff] %v161_v56 }

</bundles_post_ra>
